<compile_context>
chip_gen: v7x
topology: tpu7x:2x2x1
jax: 0.10.0
libtpu: 0.0.40
codegen_flags: <defaults>
</compile_context>

<pallas_src>
from typing import NamedTuple

import jax
import jax.numpy as jnp
from jax import lax
from jax.experimental import pallas as pl
from jax.experimental.pallas import tpu as pltpu


def _round_up(x, m):
    return (x + m - 1) // m * m


class FFNParams(NamedTuple):
    """Load-time-prepared FeedForward parameters (prepare once, not per call)."""
    w13: jax.Array   # (2*hidden, dim); hidden-tile-interleaved [W1_k ; W3_k] blocks
    w2t: jax.Array   # (hidden, dim) == W2.T (contiguous rows per hidden tile)
    tile_n: int      # hidden-tile size baked into the w13 interleave


def prepare_ffn_params(w1, w2, w3, *, tile_n=512, compute_dtype=jnp.bfloat16):
    """One-time parameter prep: fuse/interleave W1|W3, transpose W2, cast to bf16."""
    hidden, dim = w1.shape
    assert w3.shape == (hidden, dim) and w2.shape == (dim, hidden)
    tile_n = min(tile_n, hidden)
    assert hidden % tile_n == 0 and (tile_n % 128 == 0 or tile_n == hidden), (
        "tile_n must divide hidden and be a multiple of 128 (or == hidden)")
    nt = hidden // tile_n
    # Interleave so hidden-tile k is the contiguous row block [W1_k ; W3_k].
    w13 = jnp.concatenate(
        [w1.reshape(nt, tile_n, dim), w3.reshape(nt, tile_n, dim)], axis=1
    ).reshape(2 * hidden, dim)
    return FFNParams(w13.astype(compute_dtype),
                     jnp.transpose(w2).astype(compute_dtype),
                     tile_n)


def _ffn_partial(x_ref, w13_ref, w2_ref):
    """f32 partial output of one (row-tile, hidden-tile): W2_k^T (silu(W1_k x)*W3_k x)."""
    tn = w2_ref.shape[0]
    x = x_ref[...]                                              # (tm, dim) bf16
    # x @ [W1_k ; W3_k]^T — single MXU dot contracting the last axis of both
    # operands (consumes the PyTorch (out, in) weight layout directly).
    h = lax.dot_general(x, w13_ref[...],
                        dimension_numbers=(((1,), (1,)), ((), ())),
                        preferred_element_type=jnp.float32)     # (tm, 2*tn) f32
    h1 = h[:, :tn]
    h3 = h[:, tn:]
    # SiLU(h1) * h3 in f32 (VPU + EUP work, hidden under the MXU at these tiles).
    g = h1 * jax.nn.sigmoid(h1) * h3                            # (tm, tn) f32
    # Down-projection for this hidden tile: contract with contiguous W2^T rows
    # on RHS axis 0 — canonical MXU orientation.
    return lax.dot_general(g.astype(w2_ref.dtype), w2_ref[...],
                           dimension_numbers=(((1,), (0,)), ((), ())),
                           preferred_element_type=jnp.float32)  # (tm, dim) f32


def _ffn_kernel_out_acc(x_ref, w13_ref, w2_ref, o_ref):
    """f32 output: accumulate directly into the VMEM-resident output block."""
    k = pl.program_id(1)
    partial = _ffn_partial(x_ref, w13_ref, w2_ref)

    @pl.when(k == 0)
    def _first():
        o_ref[...] = partial

    @pl.when(k > 0)
    def _rest():
        o_ref[...] += partial


def _ffn_kernel_scratch_acc(x_ref, w13_ref, w2_ref, o_ref, acc_ref):
    """Non-f32 output: f32 scratch accumulator, single cast on the last hidden tile."""
    k = pl.program_id(1)
    partial = _ffn_partial(x_ref, w13_ref, w2_ref)

    @pl.when(k == 0)
    def _first():
        acc_ref[...] = partial

    @pl.when(k > 0)
    def _rest():
        acc_ref[...] += partial

    @pl.when(k == pl.num_programs(1) - 1)
    def _finalize():
        o_ref[...] = acc_ref[...].astype(o_ref.dtype)


def _vmem_capacity_bytes():
    try:
        return int(pltpu.get_tpu_info().vmem_capacity_bytes)
    except Exception:
        return 64 * 1024 * 1024   # conservative (v7x per-TensorCore VMEM)


def feed_forward(x, params: FFNParams, *, tile_m=512):
    """x: (..., dim). Output matches x.shape / x.dtype. Dropout = identity (eval mode)."""
    w13, w2t, tile_n = params
    hidden, dim = w2t.shape
    assert w13.shape == (2 * hidden, dim)
    compute_dtype = w13.dtype
    out_dtype = x.dtype

    orig_shape = x.shape
    assert orig_shape[-1] == dim
    x2d = x.reshape(-1, dim).astype(compute_dtype)
    M = x2d.shape[0]

    # Row tiling: decode-sized M only pads to the sublane tile (16 bf16 / 8 f32).
    sublane = 16 if compute_dtype == jnp.bfloat16 else 8
    tile_m = max(sublane, min(tile_m, _round_up(M, sublane)))
    tile_m = _round_up(tile_m, sublane)
    M_pad = _round_up(M, tile_m)
    if M_pad != M:
        x2d = jnp.pad(x2d, ((0, M_pad - M), (0, 0)))

    n_row_tiles = M_pad // tile_m
    n_hid_tiles = hidden // tile_n
    grid = (n_row_tiles, n_hid_tiles)

    f32_out = (out_dtype == jnp.float32)
    kernel = _ffn_kernel_out_acc if f32_out else _ffn_kernel_scratch_acc
    scratch_shapes = [] if f32_out else [pltpu.VMEM((tile_m, dim), jnp.float32)]

    # VMEM budget: double-buffered in/out blocks + (optional) f32 accumulator.
    csz = jnp.dtype(compute_dtype).itemsize
    osz = jnp.dtype(out_dtype).itemsize
    per_step = (tile_m * dim * csz            # x block
                + 2 * tile_n * dim * csz      # fused [W1;W3] block
                + tile_n * dim * csz          # W2^T block
                + tile_m * dim * osz)         # output block
    needed = 2 * per_step + (0 if f32_out else tile_m * dim * 4)
    vmem_limit = int(min(0.9 * _vmem_capacity_bytes(),
                         max(needed + (4 << 20), 32 << 20)))

    # CostEstimate: weights are re-streamed once per row tile, not once.
    flops = 6 * M_pad * dim * hidden          # 2*(M*dim*2h) + 2*(M*h*dim)
    bytes_accessed = (x2d.size * csz + M_pad * dim * osz
                      + n_row_tiles * (w13.size + w2t.size) * csz)

    out2d = pl.pallas_call(
        kernel,
        out_shape=jax.ShapeDtypeStruct((M_pad, dim), out_dtype),
        grid_spec=pltpu.PrefetchScalarGridSpec(
            num_scalar_prefetch=0,
            grid=grid,
            in_specs=[
                pl.BlockSpec((tile_m, dim), lambda i, k: (i, 0)),      # x rows
                pl.BlockSpec((2 * tile_n, dim), lambda i, k: (k, 0)),  # [W1_k;W3_k]
                pl.BlockSpec((tile_n, dim), lambda i, k: (k, 0)),      # W2^T rows
            ],
            out_specs=pl.BlockSpec((tile_m, dim), lambda i, k: (i, 0)),
            scratch_shapes=scratch_shapes,
        ),
        compiler_params=pltpu.CompilerParams(
            dimension_semantics=("parallel", "arbitrary"),
            vmem_limit_bytes=vmem_limit,
        ),
        cost_estimate=pl.CostEstimate(
            flops=flops,
            transcendentals=M_pad * hidden,
            bytes_accessed=bytes_accessed,
        ),
    )(x2d, w13, w2t)

    return out2d[:M].reshape(orig_shape)


def _ref_feed_forward(x, w1, w2, w3):
    h1 = jnp.einsum("...d,hd->...h", x, w1)
    h3 = jnp.einsum("...d,hd->...h", x, w3)
    return jnp.einsum("...h,dh->...d", jax.nn.silu(h1) * h3, w2)


if __name__ == "__main__":
    # Config consistent with FeedForward.__init__: dim=128, multiple_of=128
    #   hidden = 128 * ceil(int(2*4*128/3) / 128) = 384
    dim = 128
    multiple_of = 128
    hidden_dim = int(2 * (4 * dim) / 3)                                         # 341
    hidden_dim = multiple_of * ((hidden_dim + multiple_of - 1) // multiple_of)  # 384

    batch, seq = 2, 256   # M = 512 rows -> 2 row tiles at tile_m=256

    key = jax.random.PRNGKey(0)
    kx, k1, k2, k3 = jax.random.split(key, 4)
    x = jax.random.normal(kx, (batch, seq, dim), dtype=jnp.float32)
    # nn.Linear-shaped weights (out_features, in_features), Kaiming-uniform-ish.
    w1 = jax.random.uniform(k1, (hidden_dim, dim), jnp.float32,
                            -1.0 / dim ** 0.5, 1.0 / dim ** 0.5)
    w3 = jax.random.uniform(k3, (hidden_dim, dim), jnp.float32,
                            -1.0 / dim ** 0.5, 1.0 / dim ** 0.5)
    w2 = jax.random.uniform(k2, (dim, hidden_dim), jnp.float32,
                            -1.0 / hidden_dim ** 0.5, 1.0 / hidden_dim ** 0.5)

    # Load-time prep (done once, not per forward): fuse/interleave W1|W3,
    # transpose W2, cast everything to bf16. tile_n=128 -> 3 hidden-reduction steps.
    params = prepare_ffn_params(w1, w2, w3, tile_n=128, compute_dtype=jnp.bfloat16)

    ref = _ref_feed_forward(x, w1, w2, w3)

    def max_rel_err(out, ref_slice):
        return float(jnp.max(jnp.abs(out.astype(jnp.float32) - ref_slice))
                     / (jnp.max(jnp.abs(ref)) + 1e-6))

    # 1) f32 input/output: direct accumulate-into-output kernel, 2 parallel row tiles.
    out = jax.block_until_ready(feed_forward(x, params, tile_m=256))
    assert out.shape == x.shape and out.dtype == x.dtype
    err = max_rel_err(out, ref)
    assert err < 4e-2, f"f32-out mismatch vs reference (rel err {err})"

    # 2) bf16 input/output: exercises the f32 scratch-accumulator kernel.
    out_bf16 = jax.block_until_ready(
        feed_forward(x.astype(jnp.bfloat16), params, tile_m=256))
    assert out_bf16.shape == x.shape and out_bf16.dtype == jnp.bfloat16
    err = max_rel_err(out_bf16, ref)
    assert err < 4e-2, f"bf16-out mismatch vs reference (rel err {err})"

    # 3) decode-sized M: rows padded only to the sublane tile, not to 128.
    x_small = x[:1, :4]                                    # M = 4 rows
    out_small = jax.block_until_ready(feed_forward(x_small, params))
    assert out_small.shape == x_small.shape
    err = max_rel_err(out_small, ref[:1, :4])
    assert err < 4e-2, f"small-M mismatch vs reference (rel err {err})"

    print("KERNEL_OK")
</pallas_src>

<mosaic_0001>
module attributes {stable_mosaic.version = 11 : i64} {
  func.func @_ffn_kernel_out_acc(%arg0: i32, %arg1: i32, %arg2: memref<256x128xbf16, #tpu.memory_space<vmem>>, %arg3: memref<256x128xbf16, #tpu.memory_space<vmem>>, %arg4: memref<128x128xbf16, #tpu.memory_space<vmem>>, %arg5: memref<256x128xf32, #tpu.memory_space<vmem>>) attributes {dimension_semantics = [#tpu.dimension_semantics<parallel>, #tpu.dimension_semantics<arbitrary>], iteration_bounds = array<i64: 2, 3>, scalar_prefetch = 0 : i64, scratch_operands = 0 : i64, tpu.core_type = #tpu.core_type<tc>, window_params = [{transform_indices = @transform_0, window_bounds = array<i64: 256, 128>}, {transform_indices = @transform_1, window_bounds = array<i64: 256, 128>}, {transform_indices = @transform_2, window_bounds = array<i64: 128, 128>}, {transform_indices = @transform_3, window_bounds = array<i64: 256, 128>}]} {
    %c0 = arith.constant 0 : index
    %c0_0 = arith.constant 0 : index
    %0 = vector.load %arg2[%c0, %c0_0] : memref<256x128xbf16, #tpu.memory_space<vmem>>, vector<256x128xbf16>
    %c0_1 = arith.constant 0 : index
    %c0_2 = arith.constant 0 : index
    %1 = vector.load %arg3[%c0_1, %c0_2] : memref<256x128xbf16, #tpu.memory_space<vmem>>, vector<256x128xbf16>
    %cst = arith.constant dense<0.000000e+00> : vector<256x256xf32>
    %2 = tpu.matmul %0, %1, %cst {dimension_numbers = #tpu.dot_dimension_numbers<[1], [1], [0], [0], [0, 0, 1, 0], [], []>} : vector<256x128xbf16>, vector<256x128xbf16>, vector<256x256xf32> -> vector<256x256xf32>
    %3 = vector.extract_strided_slice %2 {offsets = [0, 0], sizes = [256, 128], strides = [1, 1]} : vector<256x256xf32> to vector<256x128xf32>
    %4 = vector.extract_strided_slice %2 {offsets = [0, 128], sizes = [256, 128], strides = [1, 1]} : vector<256x256xf32> to vector<256x128xf32>
    %5 = arith.negf %3 : vector<256x128xf32>
    %6 = math.exp %5 : vector<256x128xf32>
    %cst_3 = arith.constant 1.000000e+00 : f32
    %7 = vector.broadcast %cst_3 : f32 to vector<256x128xf32>
    %8 = arith.addf %7, %6 : vector<256x128xf32>
    %9 = arith.divf %7, %8 : vector<256x128xf32>
    %10 = arith.mulf %3, %9 : vector<256x128xf32>
    %11 = arith.mulf %10, %4 : vector<256x128xf32>
    %12 = arith.truncf %11 : vector<256x128xf32> to vector<256x128xbf16>
    %c0_4 = arith.constant 0 : index
    %c0_5 = arith.constant 0 : index
    %13 = vector.load %arg4[%c0_4, %c0_5] : memref<128x128xbf16, #tpu.memory_space<vmem>>, vector<128x128xbf16>
    %cst_6 = arith.constant dense<0.000000e+00> : vector<256x128xf32>
    %14 = tpu.matmul %12, %13, %cst_6 {dimension_numbers = #tpu.dot_dimension_numbers<[1], [0], [0], [1], [0, 0, 1, 1], [], []>} : vector<256x128xbf16>, vector<128x128xbf16>, vector<256x128xf32> -> vector<256x128xf32>
    %c0_i32 = arith.constant 0 : i32
    %15 = arith.cmpi eq, %arg1, %c0_i32 : i32
    %16 = arith.extui %15 : i1 to i32
    %c0_i32_7 = arith.constant 0 : i32
    %17 = arith.cmpi ne, %16, %c0_i32_7 : i32
    scf.if %17 {
      %c0_10 = arith.constant 0 : index
      %c0_11 = arith.constant 0 : index
      %21 = vector.load %arg5[%c0_10, %c0_11] : memref<256x128xf32, #tpu.memory_space<vmem>>, vector<256x128xf32>
      tpu.vector_store %arg5[%c0_10, %c0_11], %14 {strides = array<i32>} : memref<256x128xf32, #tpu.memory_space<vmem>>, vector<256x128xf32>,
    } else {
    }
    %c0_i32_8 = arith.constant 0 : i32
    %18 = arith.cmpi sgt, %arg1, %c0_i32_8 : i32
    %19 = arith.extui %18 : i1 to i32
    %c0_i32_9 = arith.constant 0 : i32
    %20 = arith.cmpi ne, %19, %c0_i32_9 : i32
    scf.if %20 {
      %c0_10 = arith.constant 0 : index
      %c0_11 = arith.constant 0 : index
      %21 = vector.load %arg5[%c0_10, %c0_11] : memref<256x128xf32, #tpu.memory_space<vmem>>, vector<256x128xf32>
      %22 = arith.addf %21, %14 : vector<256x128xf32>
      %c0_12 = arith.constant 0 : index
      %c0_13 = arith.constant 0 : index
      %23 = vector.load %arg5[%c0_12, %c0_13] : memref<256x128xf32, #tpu.memory_space<vmem>>, vector<256x128xf32>
      tpu.vector_store %arg5[%c0_12, %c0_13], %22 {strides = array<i32>} : memref<256x128xf32, #tpu.memory_space<vmem>>, vector<256x128xf32>,
    } else {
    }
    return
  }
  func.func @transform_0(%arg0: i32, %arg1: i32) -> (i32, i32) {
    %c0_i32 = arith.constant 0 : i32
    %c0_i32_0 = arith.constant 0 : i32
    return %arg0, %c0_i32 : i32, i32
  }
  func.func @transform_1(%arg0: i32, %arg1: i32) -> (i32, i32) {
    %c0_i32 = arith.constant 0 : i32
    %c0_i32_0 = arith.constant 0 : i32
    return %arg1, %c0_i32 : i32, i32
  }
  func.func @transform_2(%arg0: i32, %arg1: i32) -> (i32, i32) {
    %c0_i32 = arith.constant 0 : i32
    %c0_i32_0 = arith.constant 0 : i32
    return %arg1, %c0_i32 : i32, i32
  }
  func.func @transform_3(%arg0: i32, %arg1: i32) -> (i32, i32) {
    %c0_i32 = arith.constant 0 : i32
    %c0_i32_0 = arith.constant 0 : i32
    return %arg0, %c0_i32 : i32, i32
  }
}

</mosaic_0001>

<bundles_post_ra>
// kernel: tpu_custom_call.1
= control target key start
LH: loop header
LB: loop body
LE: loop exit
PB: predicated region body
PF: predicated region fallthrough
CT: control target
= control target key end

     0   :  { %s3127_s0 = inlined_call_operand.hbm [shape: bf16[512,128], index: 0, kind: input, shape index: {}]   ;;  %s3128_s1 = inlined_call_operand.hbm [shape: bf16[768,128], index: 1, kind: input, shape index: {}]   ;;  %s3129_s2 = inlined_call_operand.hbm [shape: bf16[384,128], index: 2, kind: input, shape index: {}]   ;;  %s3130_s3 = inlined_call_operand.hbm [shape: f32[512,128], index: 3, kind: output, shape index: {}]  }
   0x1   :  { %3150 = sst [smem:[#allocation21_spill]] %s3128_s1 }
   0x2   :  { %3151 = sst [smem:[#allocation22_spill]] %s3130_s3 }
   0x3   :  { %8 = vsyncpa [#allocation3], 0 }
   0x4   :  { %10 = vsyncpa [#allocation3 + $0x1], 0 }
   0x5   :  { %11 = vsyncpa [#allocation6], 0 }
   0x6   :  { %13 = vsyncpa [#allocation6 + $0x1], 0 }
   0x7   :  { %14 = vsyncpa [#allocation4], 0 }
   0x8   :  { %16 = vsyncpa [#allocation4 + $0x1], 0  ;;  %s2273_s12 = smov 0   ;;  %s2275_s13 = smov 0  }
   0x9   :  { %s2277_s14 = smov 0   ;;  %s2279_s15 = smov 0  }
   0xa   :  { %s2281_s16 = smov 0   ;;  %s2283_s17 = smov 0  }
   0xb   :  { %s2285_s18 = smov 0   ;;  %s2287_s19 = smov 0  }
   0xc   :  { %s2289_s20 = smov 0   ;;  %s2291_s21 = smov 0  }
   0xd   :  { %s2293_s22 = smov 0  }
   0xe LB: > { %3152 = sst [smem:[#allocation12_spill]] %s2211_s14  ;;  %s2327_s23 = sadd.s32 4294967295, %s2243_s22   ;;  %s2243_s22 = sphi %s2293_s22, %s22_s22   ;;  %s2239_s21 = sphi %s2291_s21, %s3193_s21   ;;  %s2235_s20 = sphi %s2289_s20, %s3192_s20   ;;  %s2231_s19 = sphi %s2287_s19, %s3191_s19   ;;  %s2227_s18 = sphi %s2285_s18, %s3190_s18   ;;  %s2223_s17 = sphi %s2283_s17, %s3198_s17   ;;  %s2219_s16 = sphi %s2281_s16, %s3197_s16   ;;  %s2215_s15 = sphi %s2279_s15, %s3196_s15   ;;  %s2211_s14 = sphi %s2277_s14, %s3187_s14   ;;  %s2207_s13 = sphi %s2275_s13, %s3195_s13   ;;  %s2203_s12 = sphi %s2273_s12, %s3194_s12  }
   0xf   : > { %3153 = sst [smem:[#allocation13_spill]] %s2215_s15  ;;  %s31_s24 = sadd.s32 1, %s2235_s20 }
  0x10   : > { %3154 = sst [smem:[#allocation14_spill]] %s2223_s17  ;;  %p2330_p0 = scmp.ge.s32.totalorder %s31_s24, 3 }
  0x11   : > { %3155 = sst [smem:[#allocation15_spill]] %s2235_s20  ;;  %p3134_p1 = scmp.eq.s32.totalorder %s2243_s22, 0 }
  0x12   : > { %3156 = sst [smem:[#allocation16_spill]] %s2239_s21  ;;  %p3133_p2 = scmp.eq.s32.totalorder %s2327_s23, 0 }
  0x13   : > { %s67_s26 = sadd.s32 1, %s2211_s14  ;;  %s3200_s24 = smov (%p2330_p0, %s31_s24), 0 }
  0x14   : > { %3158 = sst [smem:[#allocation17_spill]] %s3200_s24  ;;  %p74_p3 = scmp.ne.s32.totalorder %s2211_s14, %s2207_s13 }
  0x15   : > { %p80_p4 = scmp.ne.s32.totalorder %s2207_s13, %s2203_s12  ;;  %s64_s27 = ssub.s32 %s2235_s20, %s3200_s24 }
  0x16   : > { %p65_p5 = scmp.eq.s32.totalorder %s64_s27, 0  ;;  %p76_p6 = por %p74_p3, %p3134_p1 }
  0x17   : > { %p2350_p7 = por %p80_p4, %p3133_p2  ;;  %p3132_p8 = scmp.lt.s32.totalorder %s2243_s22, 6 }
  0x18   : > { %s2356_s29 = scalar_select %p65_p5, %s2211_s14, %s67_s26  }
  0x19   : > { %s3159_s28 = scalar_select %p2350_p7, 1, 0 }
  0x1a   : > { %3160 = sst [smem:[#allocation18_spill]] %s2356_s29  ;;  %s177_s30 = sand.u32 1, %s2243_s22  }
  0x1b   : > { %s179_s4 = sand.u32 1, %s2211_s14   ;;  %s1604_s6 = sshll.u32 %s2235_s20, 11 }
  0x1c   : > { %s1513_s5 = sshll.u32 %s179_s4, 7  ;;  %s3161_s1 = sld [smem:[#allocation21_spill]] }
  0x1d   : > { %s181_s10 = scalar_lea.vmem [#allocation5], %s1513_s5  ;;  %p2370_p9 = pnand %p3132_p8, %p76_p6 }
  0x1e   : > { %s188_s11 = sshll.u32 %s181_s10, 4  ;;  %s2374_s26 = sshll.u32 %s179_s4, 6  ;;  %s2366_s11 = int_to_ptr.vmem [resolvable:$true] %s188_s11 }
  0x1f   : > { %s2377_s27 = scalar_lea.sflag [#allocation6], %s177_s30  ;;  %p3147_p12 = pneg %p2370_p9 }
  0x22   : > { %s2364_s9 = scalar_lea.hbm %s3161_s1, %s1604_s6  ;;  %s2032_s8 = scalar_lea.hbm %s3161_s1, 6144 }
  0x23   : > { %s2027_s6 = scalar_lea.hbm %s2364_s9, 2048  ;;  %p2033_p4 = scmp.lt.u32.totalorder %s2364_s9, %s3161_s1 }
  0x24   : > { %p2028_p11 = scmp.ne.s32.totalorder %s2364_s9, %s2027_s6  ;;  %p2034_p5 = scmp.lt.u32.totalorder %s2032_s8, %s2027_s6 }
  0x25   : > { %p2036_p8 = scmp.lt.u32.totalorder %s2027_s6, %s2364_s9 }
  0x26   : > { %p2030_p13 = pnand %p3147_p12, %p2028_p11  ;;  %p2035_p6 = por %p2034_p5, %p2033_p4 }
  0x28   : > { %p2031_p3 = pneg %p2030_p13  ;;  %p2037_p2 = por %p2036_p8, %p2035_p6 }
  0x2a   : > { %p2038_p1 = pnand %p2037_p2, %p2031_p3 }
  0x2c   : > { %2041 = shalt.err (!%p2038_p1)
}
  0x2d   : > { %s2042_s30 = scalar_lea.vmem %s2366_s11, 2048  ;;  %s2245_s4 = smov [#allocation5]  }
  0x2e   : > { %p2043_p11 = scmp.ne.s32.totalorder %s2366_s11, %s2042_s30  ;;  %s2047_s5 = sshll.u32 %s2245_s4, 4  ;;  %s2048_s5 = int_to_ptr.vmem [resolvable:$false] %s2047_s5 }
  0x2f   : > { %s2049_s24 = scalar_lea.vmem %s2048_s5, 4096  ;;  %p2050_p7 = scmp.lt.s32.totalorder %s2366_s11, %s2048_s5 }
  0x30   : > { %p2045_p13 = pnand %p2043_p11, %p3147_p12  ;;  %p2051_p4 = scmp.lt.s32.totalorder %s2049_s24, %s2042_s30 }
  0x32   : > { %p2046_p10 = pneg %p2045_p13  ;;  %p2052_p5 = por %p2051_p4, %p2050_p7 }
  0x34   : > { %p2053_p8 = pnand %p2052_p5, %p2046_p10 }
  0x36   : > { %2056 = shalt.err (!%p2053_p8)
}
  0x37   : > { %s3136_s6 = smov 64   ;;  %s3138_s7 = smov 4  }
  0x38   : > { %1757 = dma.hbm_to_vmem [thread:$0]  (!%p2370_p9), %s2364_s9, 2048, %s2366_s11, %s2377_s27, %s3136_s6, %s3136_s6, %s3138_s7  }
  0x39   : > { %s202_s8 = scalar_lea.vmem [#allocation7], %s2374_s26  ;;  %p217_p1 = scmp.lt.s32.totalorder %s2243_s22, 7 }
  0x3a   : > { %s209_s10 = sshll.u32 %s202_s8, 4  ;;  %p3163_p2 = scmp.ge.s32.totalorder %s2243_s22, 1  ;;  %s2472_s10 = int_to_ptr.vmem [resolvable:$true] %s209_s10 }
  0x3b   : > { %s1507_s4 = sadd.s32 4294967294, %s2243_s22   ;;  %s34_s5 = sadd.s32 1, %s2239_s21 }
  0x3c   : > { %p2412_p7 = pnand %p3163_p2, %p217_p1  ;;  %s41_s24 = sadd.s32 1, %s2223_s17 }
  0x3d   : > { %s3202_s5 = smov (!%p2330_p0, %s34_s5), %s2239_s21  ;;  %p48_p10 = scmp.ne.s32.totalorder %s2223_s17, %s2219_s16 }
  0x3e   : > { %s3164_s30 = scalar_select %p2412_p7, 1, 0 }
  0x3f   : > { %p54_p3 = scmp.ne.s32.totalorder %s2219_s16, %s2215_s15  ;;  %p36_p6 = scmp.ge.s32.totalorder %s3202_s5, 2 }
  0x40   : > { %p130_p11 = scmp.eq.s32.totalorder %s2327_s23, 5  ;;  %p3165_p13 = scmp.eq.s32.totalorder %s2243_s22, 0 }
  0x41   : > { %p3167_p5 = scmp.eq.s32.totalorder %s2327_s23, 0  ;;  %s3204_s5 = smov (%p36_p6, %s3202_s5), 0 }
  0x42   : > { %p2429_p4 = por %p3165_p13, %p48_p10  ;;  %3169 = sst [smem:[#allocation19_spill]] %s3204_s5 }
  0x43   : > { %p2435_p8 = por %p3167_p5, %p54_p3  ;;  %p2441_p0 = por %p130_p11, %p48_p10 }
  0x44   : > { %p136_p1 = scmp.eq.s32.totalorder %s1507_s4, 5  ;;  %s38_s26 = ssub.s32 %s2239_s21, %s3204_s5 }
  0x45   : > { %s3168_s11 = scalar_select %p2435_p8, 1, 0 }
  0x46   : > { %s3170_s25 = scalar_select %p2441_p0, 1, 0 }
  0x47   : > { %s156_s8 = sand.u32 1, %s2223_s17   ;;  %p39_p2 = scmp.eq.s32.totalorder %s38_s26, 0 }
  0x48   : > { %p2448_p13 = por %p136_p1, %p54_p3  ;;  %s1510_s7 = sshll.u32 %s156_s8, 7 }
  0x49   : > { %s2453_s1 = scalar_select %p39_p2, %s2223_s17, %s41_s24  }
  0x4a   : > { %s3171_s6 = scalar_select %p2448_p13, 1, 0 }
  0x4b   : > { %3172 = sst [smem:[#allocation20_spill]] %s2453_s1  ;;  %s1603_s29 = sshll.u32 %s2239_s21, 11 }
  0x4c   : > { %s2459_s3 = scalar_lea.hbm %s3127_s0, %s1603_s29  ;;  %s160_s4 = scalar_lea.vmem [#allocation2], %s1510_s7 }
  0x4d   : > { %s167_s5 = sshll.u32 %s160_s4, 4  ;;  %p3173_p10 = scmp.lt.s32.totalorder %s2243_s22, 6  ;;  %s2461_s5 = int_to_ptr.vmem [resolvable:$true] %s167_s5 }
  0x4e   : > { %s1605_s24 = sshll.u32 %s2235_s20, 10  ;;  %s2479_s7 = scalar_lea.sflag [#allocation3], %s156_s8 }
  0x4f   : > { %p2467_p3 = pnand %p3173_p10, %p2429_p4  ;;  %s2477_s29 = scalar_lea.hbm %s3129_s2, %s1605_s24 }
  0x50   : > { %s2057_s4 = scalar_lea.hbm %s2459_s3, 2048  ;;  %s2062_s20 = scalar_lea.hbm %s3127_s0, 4096 }
  0x51   : > { %p2058_p6 = scmp.ne.s32.totalorder %s2459_s3, %s2057_s4  ;;  %p2059_p11 = pneg %p2467_p3 }
  0x52   : > { %p2063_p1 = scmp.lt.u32.totalorder %s2459_s3, %s3127_s0  ;;  %p2064_p2 = scmp.lt.u32.totalorder %s2062_s20, %s2057_s4 }
  0x53   : > { %p2060_p4 = pnand %p2059_p11, %p2058_p6  ;;  %p2066_p12 = scmp.lt.u32.totalorder %s2057_s4, %s2459_s3 }
  0x54   : > { %p2065_p10 = por %p2064_p2, %p2063_p1 }
  0x55   : > { %p2061_p5 = pneg %p2060_p4 }
  0x56   : > { %p2067_p13 = por %p2066_p12, %p2065_p10 }
  0x58   : > { %p2068_p0 = pnand %p2067_p13, %p2061_p5 }
  0x5a   : > { %2071 = shalt.err (!%p2068_p0)
}
  0x5b   : > { %s2072_s8 = scalar_lea.vmem %s2461_s5, 2048  ;;  %s2248_s21 = smov [#allocation2]  }
  0x5c   : > { %p2073_p6 = scmp.ne.s32.totalorder %s2461_s5, %s2072_s8  ;;  %s2077_s24 = sshll.u32 %s2248_s21, 4  ;;  %s2078_s24 = int_to_ptr.vmem [resolvable:$false] %s2077_s24 }
  0x5d   : > { %s2079_s1 = scalar_lea.vmem %s2078_s24, 4096  ;;  %p2080_p7 = scmp.lt.s32.totalorder %s2461_s5, %s2078_s24 }
  0x5e   : > { %p2075_p4 = pnand %p2073_p6, %p2059_p11  ;;  %p2081_p1 = scmp.lt.s32.totalorder %s2079_s1, %s2072_s8 }
  0x60   : > { %p2076_p8 = pneg %p2075_p4  ;;  %p2082_p2 = por %p2081_p1, %p2080_p7 }
  0x62   : > { %p2083_p12 = pnand %p2082_p2, %p2076_p8 }
  0x64   : > { %2086 = shalt.err (!%p2083_p12)
}
  0x65   : > { %s3175_s17 = smov 4   ;;  %s3176_s20 = smov 64  }
  0x66   : > { %1754 = dma.hbm_to_vmem [thread:$0]  (!%p2467_p3), %s2459_s3, 2048, %s2461_s5, %s2479_s7, %s3176_s20, %s3176_s20, %s3175_s17  }
  0x67   : > { %s2087_s14 = scalar_lea.hbm %s2477_s29, 1024  ;;  %p3177_p7 = pneg %p2370_p9 }
  0x68   : > { %p2088_p0 = scmp.ne.s32.totalorder %s2477_s29, %s2087_s14  ;;  %s2092_s4 = scalar_lea.hbm %s3129_s2, 3072 }
  0x69   : > { %p2093_p11 = scmp.lt.u32.totalorder %s2477_s29, %s3129_s2  ;;  %p2094_p5 = scmp.lt.u32.totalorder %s2092_s4, %s2087_s14 }
  0x6a   : > { %p2090_p8 = pnand %p2088_p0, %p3177_p7  ;;  %p2096_p6 = scmp.lt.u32.totalorder %s2087_s14, %s2477_s29 }
  0x6b   : > { %p2095_p10 = por %p2094_p5, %p2093_p11 }
  0x6c   : > { %p2091_p13 = pneg %p2090_p8 }
  0x6d   : > { %p2097_p4 = por %p2096_p6, %p2095_p10 }
  0x6f   : > { %p2098_p1 = pnand %p2097_p4, %p2091_p13 }
  0x71   : > { %2101 = shalt.err (!%p2098_p1)
}
  0x72   : > { %s2102_s3 = scalar_lea.vmem %s2472_s10, 1024  ;;  %p3178_p2 = pmov %p3177_p7 }
  0x73   : > { %p2103_p3 = scmp.ne.s32.totalorder %s2472_s10, %s2102_s3  ;;  %s2249_s5 = smov [#allocation7]  }
  0x74   : > { %s2107_s7 = sshll.u32 %s2249_s5, 4  ;;  %s2108_s7 = int_to_ptr.vmem [resolvable:$false] %s2107_s7 }
  0x75   : > { %p2105_p12 = pnand %p2103_p3, %p3178_p2  ;;  %s2109_s21 = scalar_lea.vmem %s2108_s7, 2048 }
  0x76   : > { %p2110_p7 = scmp.lt.s32.totalorder %s2472_s10, %s2108_s7  ;;  %p2111_p8 = scmp.lt.s32.totalorder %s2109_s21, %s2102_s3 }
  0x77   : > { %p2106_p0 = pneg %p2105_p12 }
  0x78   : > { %p2112_p11 = por %p2111_p8, %p2110_p7 }
  0x7a   : > { %p2113_p5 = pnand %p2112_p11, %p2106_p0 }
  0x7c   : > { %2116 = shalt.err (!%p2113_p5)
}
  0x7d   : > { %1760 = dma.hbm_to_vmem [thread:$0]  (!%p2370_p9), %s2477_s29, 1024, %s2472_s10, %s2377_s27, %s3176_s20, %s3176_s20, %s3175_s17  }
  0x7e   : > { %p3179_p13 = scmp.ne.s32.totalorder %s3164_s30, 0 }
  0x7f   : > { %s2540_s24 = sand.u32 (!%p3179_p13), 1, %s2219_s16   ;;  %p3180_p10 = scmp.ne.s32.totalorder (!%p3179_p13), %s3168_s11, 0 }
  0x80   : > { %221 = sbr.rel (%p3179_p13) target bundleno = 819 (0x333), region = 32  ;;  %s1520_s1 = sshll.u32 (!%p3179_p13), %s2540_s24, 7 }
  0x81   : > { %s224_s14 = scalar_lea.sflag (!%p3179_p13), [#allocation3], %s2540_s24  ;;  %s2544_s15 = scalar_lea.vmem (!%p3179_p13), [#allocation2], %s1520_s1 }
  0x87   : > { %2190 = dma.done.wait (%p3180_p10), %s224_s14, 2048  }
  0x88   : > { %2192 = vsyncadd (%p3180_p10), %s224_s14, 4294965248  ;;  %s232_s12 = sand.u32 1, %s2327_s23   ;;  %s234_s27 = sand.u32 1, %s2207_s13  }
  0x89   : > { %s1521_s10 = sshll.u32 %s234_s27, 7  ;;  %s233_s30 = scalar_lea.sflag [#allocation6], %s232_s12 }
  0x8a   : > { %s2554_s29 = scalar_lea.vmem [#allocation5], %s1521_s10  ;;  %p3181_p9 = scmp.ne.s32.totalorder %s3159_s28, 0 }
  0x8c   : > { %2194 = dma.done.wait (%p3181_p9), %s233_s30, 3072  }
  0x8d   : > { %2196 = vsyncadd (%p3181_p9), %s233_s30, 4294964224  ;;  %s1523_s11 = sshll.u32 %s2540_s24, 8  ;;  %v1859_v0 = vld [vmem:[%s2554_s29 + $0x40] sm:$0xff]   ;;  %v1861_v2 = vld [vmem:[%s2554_s29 + $0x48] sm:$0xff]   ;;  %s1522_s23 = sshll.u32 %s234_s27, 6 }
  0x8e   : > { %v1860_v1 = vld [vmem:[%s2554_s29] sm:$0xff]   ;;  %1607 = vmatprep.subr.bf16.mxu0 %v1859_v0  ;;  %1727 = vmatprep.subr.bf16.mxu1 %v1859_v0  ;;  %v1862_v3 = vld [vmem:[%s2554_s29 + $0x8] sm:$0xff]   ;;  %v1863_v4 = vld [vmem:[%s2554_s29 + $0x50] sm:$0xff]   ;;  %s245_s28 = scalar_lea.vmem [#allocation7], %s1522_s23  ;;  %s2893_s17 = scalar_lea.vmem [#allocation8], %s1523_s11 }
  0x8f   : > { %1608 = vmatpush3.bf16.xpose.msra.mxu0 %v1860_v1  ;;  %1735 = vmatpush3.bf16.xpose.msra.mxu1 %v1860_v1  ;;  %v1864_v5 = vld [vmem:[%s2554_s29 + $0x10] sm:$0xff]   ;;  %v1865_v6 = vld [vmem:[%s2554_s29 + $0x58] sm:$0xff]   ;;  %v1875_v7 = vld [vmem:[%s2544_s15] sm:$0xff]   ;;  %p1596_p6 = scmp.ne.s32.totalorder %s2227_s18, 0 }
  0x90   : > { %1609 = vmatprep.subr.bf16.mxu0 %v1861_v2  ;;  %1728 = vmatprep.subr.bf16.mxu1 %v1861_v2  ;;  %v1866_v8 = vld [vmem:[%s2554_s29 + $0x18] sm:$0xff]   ;;  %v1882_v9 = vld [vmem:[%s2544_s15 + $0x60] sm:$0xff]   ;;  %v1869_v12 = vld [vmem:[%s2554_s29 + $0x68] sm:$0xff]  }
  0x91   : > { %1623 = vmatprep.mubr.bf16.mxu0 %v1875_v7  ;;  %v1867_v10 = vld [vmem:[%s2554_s29 + $0x60] sm:$0xff]   ;;  %1647 = vmatprep.mubr.bf16.mxu1 %v1882_v9  ;;  %v1870_v13 = vld [vmem:[%s2554_s29 + $0x28] sm:$0xff]   ;;  %v1871_v14 = vld [vmem:[%s2554_s29 + $0x70] sm:$0xff]  }
  0x92   : > { %v1868_v11 = vld [vmem:[%s2554_s29 + $0x20] sm:$0xff]   ;;  %v1872_v15 = vld [vmem:[%s2554_s29 + $0x30] sm:$0xff]   ;;  %v1873_v16 = vld [vmem:[%s2554_s29 + $0x78] sm:$0xff]  }
  0x93   : > { %v1874_v17 = vld [vmem:[%s2554_s29 + $0x38] sm:$0xff]   ;;  %v1876_v18 = vld [vmem:[%s2544_s15 + $0x8] sm:$0xff]   ;;  %v1877_v20 = vld [vmem:[%s2544_s15 + $0x10] sm:$0xff]  }
  0x94   : > { %v1884_v19 = vld [vmem:[%s2544_s15 + $0x68] sm:$0xff]   ;;  %v1886_v21 = vld [vmem:[%s2544_s15 + $0x70] sm:$0xff]   ;;  %v1878_v22 = vld [vmem:[%s2544_s15 + $0x18] sm:$0xff]  }
  0x95   : > { %v1888_v23 = vld [vmem:[%s2544_s15 + $0x78] sm:$0xff]   ;;  %v1879_v24 = vld [vmem:[%s2544_s15 + $0x20] sm:$0xff]   ;;  %v1880_v25 = vld [vmem:[%s2544_s15 + $0x28] sm:$0xff]  }
  0x96   : > { %v1881_v26 = vld [vmem:[%s2544_s15 + $0x30] sm:$0xff]   ;;  %v1883_v27 = vld [vmem:[%s2544_s15 + $0x38] sm:$0xff]   ;;  %v1885_v28 = vld [vmem:[%s2544_s15 + $0x40] sm:$0xff]  }
  0x97   : > { %1610 = vmatpush3.bf16.xpose.msra.mxu0 %v1862_v3  ;;  %1736 = vmatpush3.bf16.xpose.msra.mxu1 %v1862_v3  ;;  %v1887_v29 = vld [vmem:[%s2544_s15 + $0x48] sm:$0xff]   ;;  %v1889_v30 = vld [vmem:[%s2544_s15 + $0x50] sm:$0xff]   ;;  %v1890_v31 = vld [vmem:[%s2544_s15 + $0x58] sm:$0xff]  }
  0x98   : > { %1611 = vmatprep.subr.bf16.mxu0 %v1863_v4  ;;  %1729 = vmatprep.subr.bf16.mxu1 %v1863_v4  ;;  %v1891_v32 = vld [vmem:[%s245_s28] sm:$0xff]   ;;  %v1892_v33 = vld [vmem:[%s245_s28 + $0x8] sm:$0xff]   ;;  %v1893_v34 = vld [vmem:[%s245_s28 + $0x10] sm:$0xff]  }
  0x99   : > { %v1894_v35 = vld [vmem:[%s245_s28 + $0x18] sm:$0xff]   ;;  %v1895_v36 = vld [vmem:[%s245_s28 + $0x20] sm:$0xff]   ;;  %v1896_v37 = vld [vmem:[%s245_s28 + $0x28] sm:$0xff]  }
  0x9a   : > { %v1897_v38 = vld [vmem:[%s245_s28 + $0x30] sm:$0xff]   ;;  %v1898_v39 = vld [vmem:[%s245_s28 + $0x38] sm:$0xff]  }
  0x9f   : > { %1612 = vmatpush3.bf16.xpose.msra.mxu0 %v1864_v5  ;;  %1737 = vmatpush3.bf16.xpose.msra.mxu1 %v1864_v5 }
  0xa0   : > { %1613 = vmatprep.subr.bf16.mxu0 %v1865_v6  ;;  %1730 = vmatprep.subr.bf16.mxu1 %v1865_v6 }
  0xa7   : > { %1614 = vmatpush3.bf16.xpose.msra.mxu0 %v1866_v8  ;;  %1738 = vmatpush3.bf16.xpose.msra.mxu1 %v1866_v8 }
  0xa8   : > { %1615 = vmatprep.subr.bf16.mxu0 %v1867_v10  ;;  %1731 = vmatprep.subr.bf16.mxu1 %v1867_v10 }
  0xaf   : > { %1616 = vmatpush3.bf16.xpose.msra.mxu0 %v1868_v11  ;;  %1739 = vmatpush3.bf16.xpose.msra.mxu1 %v1868_v11 }
  0xb0   : > { %1617 = vmatprep.subr.bf16.mxu0 %v1869_v12  ;;  %1732 = vmatprep.subr.bf16.mxu1 %v1869_v12 }
  0xb7   : > { %1618 = vmatpush3.bf16.xpose.msra.mxu0 %v1870_v13  ;;  %1740 = vmatpush3.bf16.xpose.msra.mxu1 %v1870_v13 }
  0xb8   : > { %1619 = vmatprep.subr.bf16.mxu0 %v1871_v14  ;;  %1733 = vmatprep.subr.bf16.mxu1 %v1871_v14 }
  0xbf   : > { %1620 = vmatpush3.bf16.xpose.msra.mxu0 %v1872_v15  ;;  %1741 = vmatpush3.bf16.xpose.msra.mxu1 %v1872_v15 }
  0xc0   : > { %1621 = vmatprep.subr.bf16.mxu0 %v1873_v16  ;;  %1734 = vmatprep.subr.bf16.mxu1 %v1873_v16 }
  0xc7   : > { %1622 = vmatpush3.bf16.xpose.msra.mxu0 %v1874_v17  ;;  %1742 = vmatpush3.bf16.xpose.msra.mxu1 %v1874_v17 }
  0xc8   : > { %1679 = vmatprep.subr.bf16.mxu1 %v1891_v32 }
  0xce   : > { %1624 = vmatmul.mubr.bf16.vlgmr.msra.gmra.mrb[0].mxu0 %v1875_v7  ;;  %1648 = vmatmul.mubr.bf16.vlgmr.msra.gmra.mrb[0].mxu1 %v1882_v9 }
  0xcf   : > { %1625 = vmatprep.mubr.bf16.mxu0 %v1876_v18  ;;  %1649 = vmatprep.mubr.bf16.mxu1 %v1884_v19 }
  0xd0   : > { %1680 = vmatpush3.bf16.msra.mxu1 %v1891_v32 }
  0xd1   : > { %1681 = vmatprep.subr.bf16.mxu1 %v1892_v33 }
  0xd4   : > { %1682 = vmatpush3.bf16.msra.mxu1 %v1892_v33 }
  0xd5   : > { %1683 = vmatprep.subr.bf16.mxu1 %v1893_v34 }
  0xd6   : > { %1626 = vmatmul.mubr.bf16.gmra.mrb[4].mxu0 %v1876_v18  ;;  %1650 = vmatmul.mubr.bf16.gmra.mrb[4].mxu1 %v1884_v19 }
  0xd7   : > { %1627 = vmatprep.mubr.bf16.mxu0 %v1877_v20  ;;  %1651 = vmatprep.mubr.bf16.mxu1 %v1886_v21 }
  0xd8   : > { %1684 = vmatpush3.bf16.msra.mxu1 %v1893_v34 }
  0xd9   : > { %1685 = vmatprep.subr.bf16.mxu1 %v1894_v35 }
  0xdc   : > { %1686 = vmatpush3.bf16.msra.mxu1 %v1894_v35 }
  0xdd   : > { %1687 = vmatprep.subr.bf16.mxu1 %v1895_v36 }
  0xde   : > { %1628 = vmatmul.mubr.bf16.gmra.mrb[8].mxu0 %v1877_v20  ;;  %1652 = vmatmul.mubr.bf16.gmra.mrb[8].mxu1 %v1886_v21 }
  0xdf   : > { %1629 = vmatprep.mubr.bf16.mxu0 %v1878_v22  ;;  %1653 = vmatprep.mubr.bf16.mxu1 %v1888_v23 }
  0xe0   : > { %1688 = vmatpush3.bf16.msra.mxu1 %v1895_v36 }
  0xe1   : > { %1689 = vmatprep.subr.bf16.mxu1 %v1896_v37 }
  0xe4   : > { %1690 = vmatpush3.bf16.msra.mxu1 %v1896_v37 }
  0xe5   : > { %1691 = vmatprep.subr.bf16.mxu1 %v1897_v38 }
  0xe6   : > { %1630 = vmatmul.mubr.bf16.gmra.mrb[12].mxu0 %v1878_v22  ;;  %1654 = vmatmul.mubr.bf16.gmra.mrb[12].mxu1 %v1888_v23 }
  0xe7   : > { %1631 = vmatprep.mubr.bf16.mxu0 %v1879_v24 }
  0xe8   : > { %1692 = vmatpush3.bf16.msra.mxu1 %v1897_v38 }
  0xe9   : > { %1693 = vmatprep.subr.bf16.mxu1 %v1898_v39 }
  0xec   : > { %1694 = vmatpush3.bf16.msra.mxu1 %v1898_v39 }
  0xee   : > { %1632 = vmatmul.mubr.bf16.gmra.mrb[16].mxu0 %v1879_v24 }
  0xef   : > { %1633 = vmatprep.mubr.bf16.mxu0 %v1880_v25 }
  0xf6   : > { %1634 = vmatmul.mubr.bf16.gmra.mrb[20].mxu0 %v1880_v25 }
  0xf7   : > { %1635 = vmatprep.mubr.bf16.mxu0 %v1881_v26 }
  0xfe   : > { %1636 = vmatmul.mubr.bf16.gmra.mrb[24].mxu0 %v1881_v26 }
  0xff   : > { %1637 = vmatprep.mubr.bf16.mxu0 %v1883_v27 }
 0x106   : > { %1638 = vmatmul.mubr.bf16.gmra.mrb[28].mxu0 %v1883_v27 }
 0x107   : > { %1639 = vmatprep.mubr.bf16.mxu0 %v1885_v28 }
 0x10e   : > { %1640 = vmatmul.mubr.bf16.gmra.mrb[32].mxu0 %v1885_v28 }
 0x10f   : > { %1641 = vmatprep.mubr.bf16.mxu0 %v1887_v29 }
 0x116   : > { %1642 = vmatmul.mubr.bf16.gmra.mrb[36].mxu0 %v1887_v29 }
 0x117   : > { %1643 = vmatprep.mubr.bf16.mxu0 %v1889_v30 }
 0x11e   : > { %1644 = vmatmul.mubr.bf16.gmra.mrb[40].mxu0 %v1889_v30 }
 0x11f   : > { %1645 = vmatprep.mubr.bf16.mxu0 %v1890_v31 }
 0x126   : > { %1646 = vmatmul.mubr.bf16.gmra.mrb[44].mxu0 %v1890_v31 }
 0x1a1   : > { %v2595_v40 = vpop.f32.mrb[0].mxu0  ;;  %v2597_v41 = vpop.f32.mrb[0].mxu1 }
 0x1a2   : > { %v1556_v42 = vmul.f32 -1.442695, %v2595_v40  ;;  %v2600_v43 = vpop.f32.mrb[1].mxu0  ;;  %v1580_v44 = vmul.f32 -1.442695, %v2597_v41  ;;  %v2603_v45 = vpop.f32.mrb[1].mxu1 }
 0x1a3   : > { %v2605_v46 = vpop.f32.mrb[2].mxu0  ;;  %v2607_v47 = vpop.f32.mrb[2].mxu1 }
 0x1a4   : > { %1899 = vpow2.f32 %v1556_v42  ;;  %v1557_v48 = vmul.f32 -1.442695, %v2605_v46  ;;  %v2610_v49 = vpop.f32.mrb[3].mxu0  ;;  %v1581_v50 = vmul.f32 -1.442695, %v2607_v47  ;;  %v2613_v51 = vpop.f32.mrb[3].mxu1 }
 0x1a5   : > { %1901 = vpow2.f32 %v1580_v44 }
 0x1a6   : > { %1903 = vpow2.f32 %v1557_v48 }
 0x1a7   : > { %1905 = vpow2.f32 %v1581_v50 }
 0x1a9   : > { %v2615_v52 = vpop.f32.mrb[4].mxu0  ;;  %v2617_v53 = vpop.f32.mrb[4].mxu1 }
 0x1aa   : > { %v1558_v54 = vmul.f32 -1.442695, %v2615_v52  ;;  %v2620_v55 = vpop.f32.mrb[5].mxu0  ;;  %v1582_v56 = vmul.f32 -1.442695, %v2617_v53  ;;  %v2623_v57 = vpop.f32.mrb[5].mxu1 }
 0x1ab   : > { %v2625_v58 = vpop.f32.mrb[6].mxu0  ;;  %v2627_v59 = vpop.f32.mrb[6].mxu1 }
 0x1ac   : > { %1907 = vpow2.f32 %v1558_v54  ;;  %v1559_v60 = vmul.f32 -1.442695, %v2625_v58  ;;  %v2630_v61 = vpop.f32.mrb[7].mxu0  ;;  %v1583_v62 = vmul.f32 -1.442695, %v2627_v59  ;;  %v2633_v63 = vpop.f32.mrb[7].mxu1 }
 0x1ad   : > { %1909 = vpow2.f32 %v1582_v56 }
 0x1ae   : > { %v1900_v0 = vpop.eup %1899  ;;  %1911 = vpow2.f32 %v1559_v60 }
 0x1af   : > { %v1902_v1 = vpop.eup %1901  ;;  %v828_v2 = vadd.f32 1.0, %v1900_v0  ;;  %1913 = vpow2.f32 %v1583_v62 }
 0x1b0   : > { %v1904_v3 = vpop.eup %1903  ;;  %v852_v4 = vadd.f32 1.0, %v1902_v1 }
 0x1b1   : > { %v1906_v5 = vpop.eup %1905  ;;  %1915 = vrcp.f32 %v828_v2  ;;  %v829_v6 = vadd.f32 1.0, %v1904_v3  ;;  %v2635_v7 = vpop.f32.mrb[8].mxu0 }
 0x1b2   : > { %v2637_v8 = vpop.f32.mrb[8].mxu1  ;;  %v1560_v9 = vmul.f32 -1.442695, %v2635_v7  ;;  %v2640_v10 = vpop.f32.mrb[9].mxu0  ;;  %1917 = vrcp.f32 %v852_v4  ;;  %v853_v11 = vadd.f32 1.0, %v1906_v5 }
 0x1b3   : > { %1919 = vrcp.f32 %v829_v6  ;;  %v2642_v12 = vpop.f32.mrb[10].mxu0  ;;  %v1584_v13 = vmul.f32 -1.442695, %v2637_v8  ;;  %v2645_v14 = vpop.f32.mrb[9].mxu1 }
 0x1b4   : > { %1921 = vpow2.f32 %v1560_v9  ;;  %v1561_v15 = vmul.f32 -1.442695, %v2642_v12  ;;  %v2648_v16 = vpop.f32.mrb[11].mxu0  ;;  %v2650_v17 = vpop.f32.mrb[10].mxu1 }
 0x1b5   : > { %1923 = vrcp.f32 %v853_v11  ;;  %v1585_v18 = vmul.f32 -1.442695, %v2650_v17  ;;  %v2653_v19 = vpop.f32.mrb[11].mxu1 }
 0x1b6   : > { %v1908_v20 = vpop.eup %1907  ;;  %1925 = vpow2.f32 %v1561_v15 }
 0x1b7   : > { %v1910_v21 = vpop.eup %1909  ;;  %v830_v22 = vadd.f32 1.0, %v1908_v20  ;;  %1927 = vpow2.f32 %v1584_v13 }
 0x1b8   : > { %v1912_v23 = vpop.eup %1911  ;;  %v854_v24 = vadd.f32 1.0, %v1910_v21  ;;  %1929 = vpow2.f32 %v1585_v18 }
 0x1b9   : > { %v1914_v25 = vpop.eup %1913  ;;  %1931 = vrcp.f32 %v830_v22  ;;  %v831_v26 = vadd.f32 1.0, %v1912_v23  ;;  %v2655_v27 = vpop.f32.mrb[12].mxu0 }
 0x1ba   : > { %v2657_v28 = vpop.f32.mrb[12].mxu1  ;;  %v1562_v29 = vmul.f32 -1.442695, %v2655_v27  ;;  %v2660_v30 = vpop.f32.mrb[13].mxu0  ;;  %1933 = vrcp.f32 %v854_v24  ;;  %v855_v31 = vadd.f32 1.0, %v1914_v25 }
 0x1bb   : > { %v1916_v32 = vpop.eup %1915  ;;  %1935 = vrcp.f32 %v831_v26  ;;  %v2662_v33 = vpop.f32.mrb[14].mxu0  ;;  %v1586_v34 = vmul.f32 -1.442695, %v2657_v28 }
 0x1bc   : > { %v2665_v35 = vpop.f32.mrb[13].mxu1  ;;  %v1918_v36 = vpop.eup %1917  ;;  %v924_v37 = vmul.f32 %v1916_v32, %v2595_v40  ;;  %1937 = vpow2.f32 %v1562_v29  ;;  %v1563_v38 = vmul.f32 -1.442695, %v2662_v33 }
 0x1bd   : > { %v2669_v39 = vpop.f32.mrb[15].mxu0  ;;  %v2671_v42 = vpop.f32.mrb[14].mxu1  ;;  %v948_v48 = vmul.f32 %v1918_v36, %v2597_v41  ;;  %1939 = vrcp.f32 %v855_v31 }
 0x1be   : > { %v1920_v44 = vpop.eup %1919  ;;  %v1587_v50 = vmul.f32 -1.442695, %v2671_v42  ;;  %v2675_v54 = vpop.f32.mrb[15].mxu1  ;;  %v956_v60 = vmul.f32 %v924_v37, %v2600_v43  ;;  %1941 = vpow2.f32 %v1563_v38 }
 0x1bf   : > { %v1922_v56 = vpop.eup %1921  ;;  %v925_v40 = vmul.f32 %v1920_v44, %v2605_v46  ;;  %v2680_v1 = vmul.f32 %v948_v48, %v2603_v45  ;;  %1943 = vpow2.f32 %v1586_v34 }
 0x1c0   : > { %v1924_v62 = vpop.eup %1923  ;;  %v832_v0 = vadd.f32 1.0, %v1922_v56  ;;  %1945 = vpow2.f32 %v1587_v50 }
 0x1c1   : > { %v1926_v2 = vpop.eup %1925  ;;  %v957_v41 = vmul.f32 %v925_v40, %v2610_v49  ;;  %v949_v3 = vmul.f32 %v1924_v62, %v2607_v47  ;;  %v2684_v6 = vpop.f32.mrb[16].mxu0 }
 0x1c2   : > { %v1928_v4 = vpop.eup %1927  ;;  %1947 = vrcp.f32 %v832_v0  ;;  %v833_v5 = vadd.f32 1.0, %v1926_v2  ;;  %v1564_v9 = vmul.f32 -1.442695, %v2684_v6  ;;  %v2687_v11 = vpop.f32.mrb[17].mxu0 }
 0x1c3   : > { %v1930_v43 = vpop.eup %1929  ;;  %v988_v46 = vpack.c.bf16 %v957_v41, %v956_v60  ;;  %v2690_v45 = vmul.f32 %v949_v3, %v2613_v51  ;;  %v856_v13 = vadd.f32 1.0, %v1928_v4  ;;  %v2692_v49 = vpop.f32.mrb[18].mxu0 }
 0x1c4   : > { %v1932_v15 = vpop.eup %1931  ;;  %1949 = vrcp.f32 %v833_v5  ;;  %v857_v47 = vadd.f32 1.0, %v1930_v43  ;;  %v1565_v21 = vmul.f32 -1.442695, %v2692_v49  ;;  %v2696_v22 = vpop.f32.mrb[19].mxu0 }
 0x1c5   : > { %v1934_v18 = vpop.eup %1933  ;;  %v926_v20 = vmul.f32 %v1932_v15, %v2615_v52  ;;  %1951 = vpow2.f32 %v1564_v9  ;;  %1695 = vmatprep.mubr.bf16.mxu1 %v988_v46  ;;  %v1000_v23 = vpack.c.bf16 %v2690_v45, %v2680_v1 }
 0x1c6   : > { %v1936_v51 = vpop.eup %1935  ;;  %v950_v24 = vmul.f32 %v1934_v18, %v2617_v53  ;;  %1953 = vrcp.f32 %v856_v13 }
 0x1c7   : > { %v1938_v25 = vpop.eup %1937  ;;  %v958_v26 = vmul.f32 %v926_v20, %v2620_v55  ;;  %v927_v29 = vmul.f32 %v1936_v51, %v2625_v58  ;;  %1955 = vpow2.f32 %v1565_v21 }
 0x1c8   : > { %v1940_v52 = vpop.eup %1939  ;;  %v834_v31 = vadd.f32 1.0, %v1938_v25  ;;  %v2704_v32 = vmul.f32 %v950_v24, %v2623_v57  ;;  %1957 = vrcp.f32 %v857_v47 }
 0x1c9   : > { %v1942_v34 = vpop.eup %1941  ;;  %v959_v36 = vmul.f32 %v927_v29, %v2630_v61  ;;  %v951_v37 = vmul.f32 %v1940_v52, %v2627_v59  ;;  %v2708_v44 = vpop.f32.mrb[20].mxu0 }
 0x1ca   : > { %v1944_v38 = vpop.eup %1943  ;;  %1959 = vrcp.f32 %v834_v31  ;;  %v835_v53 = vadd.f32 1.0, %v1942_v34  ;;  %v1566_v58 = vmul.f32 -1.442695, %v2708_v44  ;;  %v2711_v50 = vpop.f32.mrb[21].mxu0 }
 0x1cb   : > { %v1946_v55 = vpop.eup %1945  ;;  %v989_v48 = vpack.c.bf16 %v959_v36, %v958_v26  ;;  %v2714_v57 = vmul.f32 %v951_v37, %v2633_v63  ;;  %v858_v56 = vadd.f32 1.0, %v1944_v38  ;;  %v2716_v61 = vpop.f32.mrb[22].mxu0 }
 0x1cc   : > { %v1948_v60 = vpop.eup %1947  ;;  %1961 = vrcp.f32 %v835_v53  ;;  %v859_v59 = vadd.f32 1.0, %v1946_v55  ;;  %v1567_v62 = vmul.f32 -1.442695, %v2716_v61  ;;  %v2720_v0 = vpop.f32.mrb[23].mxu0 }
 0x1cd   : > { %v928_v40 = vmul.f32 %v1948_v60, %v2635_v7  ;;  %1963 = vpow2.f32 %v1566_v58  ;;  %1696 = vmatmul.mubr.bf16.vlgmr.msra.gmra.mrb[16].mxu1 %v989_v48  ;;  %v1001_v2 = vpack.c.bf16 %v2714_v57, %v2704_v32 }
 0x1ce   : > { %v1950_v41 = vpop.eup %1949  ;;  %1965 = vrcp.f32 %v858_v56 }
 0x1cf   : > { %v1952_v63 = vpop.eup %1951  ;;  %v960_v3 = vmul.f32 %v928_v40, %v2640_v10  ;;  %v929_v4 = vmul.f32 %v1950_v41, %v2642_v12  ;;  %1967 = vpow2.f32 %v1567_v62 }
 0x1d0   : > { %v1954_v5 = vpop.eup %1953  ;;  %v836_v43 = vadd.f32 1.0, %v1952_v63  ;;  %1969 = vrcp.f32 %v859_v59 }
 0x1d1   : > { %v1956_v7 = vpop.eup %1955  ;;  %v961_v46 = vmul.f32 %v929_v4, %v2648_v16  ;;  %v952_v9 = vmul.f32 %v1954_v5, %v2637_v8  ;;  %v2728_v47 = vpop.f32.mrb[24].mxu0 }
 0x1d2   : > { %v1958_v13 = vpop.eup %1957  ;;  %1971 = vrcp.f32 %v836_v43  ;;  %v837_v15 = vadd.f32 1.0, %v1956_v7  ;;  %v1568_v20 = vmul.f32 -1.442695, %v2728_v47  ;;  %v2731_v10 = vpop.f32.mrb[25].mxu0 }
 0x1d3   : > { %v990_v18 = vpack.c.bf16 %v961_v46, %v960_v3  ;;  %v2734_v12 = vmul.f32 %v952_v9, %v2645_v14  ;;  %v953_v21 = vmul.f32 %v1958_v13, %v2650_v17  ;;  %v2737_v16 = vpop.f32.mrb[26].mxu0 }
 0x1d4   : > { %v1960_v51 = vpop.eup %1959  ;;  %1973 = vrcp.f32 %v837_v15  ;;  %v1569_v24 = vmul.f32 -1.442695, %v2737_v16  ;;  %v2741_v25 = vpop.f32.mrb[27].mxu0 }
 0x1d5   : > { %v930_v8 = vmul.f32 %v1960_v51, %v2655_v27  ;;  %1975 = vpow2.f32 %v1568_v20  ;;  %1699 = vmatprep.mubr.bf16.mxu1 %v990_v18  ;;  %v2744_v26 = vmul.f32 %v953_v21, %v2653_v19 }
 0x1d6   : > { %v1962_v29 = vpop.eup %1961  ;;  %1977 = vpow2.f32 %v1569_v24 }
 0x1d7   : > { %v1964_v14 = vpop.eup %1963  ;;  %v962_v52 = vmul.f32 %v930_v8, %v2660_v30  ;;  %v931_v17 = vmul.f32 %v1962_v29, %v2662_v33  ;;  %v1002_v31 = vpack.c.bf16 %v2744_v26, %v2734_v12 }
 0x1d8   : > { %v1966_v27 = vpop.eup %1965  ;;  %v838_v34 = vadd.f32 1.0, %v1964_v14 }
 0x1d9   : > { %v1968_v36 = vpop.eup %1967  ;;  %v963_v37 = vmul.f32 %v931_v17, %v2669_v39  ;;  %v954_v38 = vmul.f32 %v1966_v27, %v2657_v28  ;;  %v2752_v55 = vpop.f32.mrb[28].mxu0 }
 0x1da   : > { %v1970_v53 = vpop.eup %1969  ;;  %1979 = vrcp.f32 %v838_v34  ;;  %v839_v19 = vadd.f32 1.0, %v1968_v36  ;;  %v1570_v30 = vmul.f32 -1.442695, %v2752_v55  ;;  %v2755_v33 = vpop.f32.mrb[29].mxu0 }
 0x1db   : > { %v991_v48 = vpack.c.bf16 %v963_v37, %v962_v52  ;;  %v2758_v58 = vmul.f32 %v954_v38, %v2665_v35  ;;  %v955_v56 = vmul.f32 %v1970_v53, %v2671_v42  ;;  %v2761_v39 = vpop.f32.mrb[30].mxu0 }
 0x1dc   : > { %v1972_v60 = vpop.eup %1971  ;;  %1981 = vrcp.f32 %v839_v19  ;;  %v1571_v59 = vmul.f32 -1.442695, %v2761_v39  ;;  %v2765_v40 = vpop.f32.mrb[31].mxu0 }
 0x1dd   : > { %v932_v28 = vmul.f32 %v1972_v60, %v2684_v6  ;;  %1983 = vpow2.f32 %v1570_v30  ;;  %1700 = vmatmul.mubr.bf16.gmra.mrb[20].mxu1 %v991_v48  ;;  %v2768_v62 = vmul.f32 %v955_v56, %v2675_v54 }
 0x1de   : > { %v1974_v41 = vpop.eup %1973  ;;  %1985 = vpow2.f32 %v1571_v59 }
 0x1df   : > { %v1976_v35 = vpop.eup %1975  ;;  %v964_v63 = vmul.f32 %v932_v28, %v2687_v11  ;;  %v933_v42 = vmul.f32 %v1974_v41, %v2692_v49  ;;  %v1003_v3 = vpack.c.bf16 %v2768_v62, %v2758_v58 }
 0x1e0   : > { %v840_v6 = vadd.f32 1.0, %v1976_v35  ;;  %v1978_v4 = vpop.eup %1977 }
 0x1e1   : > { %v965_v5 = vmul.f32 %v933_v42, %v2696_v22  ;;  %v841_v43 = vadd.f32 1.0, %v1978_v4  ;;  %v2775_v7 = vpop.f32.mrb[32].mxu0 }
 0x1e2   : > { %1987 = vrcp.f32 %v840_v6  ;;  %v1572_v46 = vmul.f32 -1.442695, %v2775_v7  ;;  %v2778_v9 = vpop.f32.mrb[33].mxu0 }
 0x1e3   : > { %v992_v54 = vpack.c.bf16 %v965_v5, %v964_v63  ;;  %1989 = vrcp.f32 %v841_v43  ;;  %v2780_v49 = vpop.f32.mrb[34].mxu0 }
 0x1e4   : > { %v1980_v11 = vpop.eup %1979  ;;  %1991 = vpow2.f32 %v1572_v46  ;;  %v1573_v15 = vmul.f32 -1.442695, %v2780_v49  ;;  %v2784_v18 = vpop.f32.mrb[35].mxu0 }
 0x1e5   : > { %v934_v13 = vmul.f32 %v1980_v11, %v2708_v44  ;;  %1703 = vmatprep.mubr.bf16.mxu1 %v992_v54 }
 0x1e6   : > { %v1982_v22 = vpop.eup %1981  ;;  %1993 = vpow2.f32 %v1573_v15 }
 0x1e7   : > { %v1984_v20 = vpop.eup %1983  ;;  %v966_v21 = vmul.f32 %v934_v13, %v2711_v50  ;;  %v935_v51 = vmul.f32 %v1982_v22, %v2716_v61 }
 0x1e8   : > { %v842_v8 = vadd.f32 1.0, %v1984_v20  ;;  %v1986_v24 = vpop.eup %1985 }
 0x1e9   : > { %v967_v29 = vmul.f32 %v935_v51, %v2720_v0  ;;  %v843_v14 = vadd.f32 1.0, %v1986_v24  ;;  %v2789_v44 = vpop.f32.mrb[36].mxu0 }
 0x1ea   : > { %1995 = vrcp.f32 %v842_v8  ;;  %v1574_v17 = vmul.f32 -1.442695, %v2789_v44  ;;  %v2792_v27 = vpop.f32.mrb[37].mxu0 }
 0x1eb   : > { %v993_v52 = vpack.c.bf16 %v967_v29, %v966_v21  ;;  %1997 = vrcp.f32 %v843_v14  ;;  %v2794_v36 = vpop.f32.mrb[38].mxu0 }
 0x1ec   : > { %v1988_v34 = vpop.eup %1987  ;;  %1999 = vpow2.f32 %v1574_v17  ;;  %v1575_v61 = vmul.f32 -1.442695, %v2794_v36  ;;  %v2798_v37 = vpop.f32.mrb[39].mxu0 }
 0x1ed   : > { %v936_v50 = vmul.f32 %v1988_v34, %v2728_v47  ;;  %1704 = vmatmul.mubr.bf16.gmra.mrb[24].mxu1 %v993_v52  ;;  %v1990_v0 = vpop.eup %1989 }
 0x1ee   : > { %v1992_v38 = vpop.eup %1991  ;;  %v937_v19 = vmul.f32 %v1990_v0, %v2737_v16  ;;  %2001 = vpow2.f32 %v1575_v61 }
 0x1ef   : > { %v968_v53 = vmul.f32 %v936_v50, %v2731_v10  ;;  %v844_v48 = vadd.f32 1.0, %v1992_v38 }
 0x1f0   : > { %v1994_v30 = vpop.eup %1993  ;;  %v969_v56 = vmul.f32 %v937_v19, %v2741_v25 }
 0x1f1   : > { %2003 = vrcp.f32 %v844_v48  ;;  %v845_v60 = vadd.f32 1.0, %v1994_v30  ;;  %v673_v47 = vpop.f32.mrb[40].mxu0 }
 0x1f2   : > { %v994_v28 = vpack.c.bf16 %v969_v56, %v968_v53  ;;  %v1576_v59 = vmul.f32 -1.442695, %v673_v47  ;;  %v675_v41 = vpop.f32.mrb[41].mxu0 }
 0x1f3   : > { %2005 = vrcp.f32 %v845_v60  ;;  %v677_v63 = vpop.f32.mrb[42].mxu0 }
 0x1f4   : > { %v1996_v35 = vpop.eup %1995  ;;  %2007 = vpow2.f32 %v1576_v59  ;;  %v1577_v10 = vmul.f32 -1.442695, %v677_v63  ;;  %v679_v6 = vpop.f32.mrb[43].mxu0  ;;  %1707 = vmatprep.mubr.bf16.mxu1 %v994_v28 }
 0x1f5   : > { %v938_v42 = vmul.f32 %v1996_v35, %v2752_v55  ;;  %v1998_v16 = vpop.eup %1997 }
 0x1f6   : > { %v2000_v4 = vpop.eup %1999  ;;  %v939_v25 = vmul.f32 %v1998_v16, %v2761_v39  ;;  %2009 = vpow2.f32 %v1577_v10 }
 0x1f7   : > { %v970_v5 = vmul.f32 %v938_v42, %v2755_v33  ;;  %v846_v43 = vadd.f32 1.0, %v2000_v4 }
 0x1f8   : > { %v2002_v54 = vpop.eup %2001  ;;  %v971_v46 = vmul.f32 %v939_v25, %v2765_v40 }
 0x1f9   : > { %2011 = vrcp.f32 %v846_v43  ;;  %v847_v11 = vadd.f32 1.0, %v2002_v54  ;;  %v683_v13 = vpop.f32.mrb[44].mxu0 }
 0x1fa   : > { %v995_v15 = vpack.c.bf16 %v971_v46, %v970_v5  ;;  %v1578_v55 = vmul.f32 -1.442695, %v683_v13  ;;  %v685_v22 = vpop.f32.mrb[45].mxu0 }
 0x1fb   : > { %v2004_v20 = vpop.eup %2003  ;;  %2013 = vrcp.f32 %v847_v11  ;;  %v687_v21 = vpop.f32.mrb[46].mxu0 }
 0x1fc   : > { %v940_v51 = vmul.f32 %v2004_v20, %v2775_v7  ;;  %2015 = vpow2.f32 %v1578_v55  ;;  %v1579_v33 = vmul.f32 -1.442695, %v687_v21  ;;  %v689_v8 = vpop.f32.mrb[47].mxu0  ;;  %1708 = vmatmul.mubr.bf16.gmra.mrb[28].mxu1 %v995_v15 }
 0x1fd   : > { %v2006_v39 = vpop.eup %2005 }
 0x1fe   : > { %v2008_v24 = vpop.eup %2007  ;;  %v972_v29 = vmul.f32 %v940_v51, %v2778_v9  ;;  %v941_v40 = vmul.f32 %v2006_v39, %v2780_v49  ;;  %2017 = vpow2.f32 %v1579_v33 }
 0x1ff   : > { %v848_v14 = vadd.f32 1.0, %v2008_v24 }
 0x200   : > { %v2010_v52 = vpop.eup %2009  ;;  %v973_v17 = vmul.f32 %v941_v40, %v2784_v18 }
 0x201   : > { %2019 = vrcp.f32 %v848_v14  ;;  %v849_v34 = vadd.f32 1.0, %v2010_v52 }
 0x202   : > { %v996_v50 = vpack.c.bf16 %v973_v17, %v972_v29 }
 0x203   : > { %v2012_v61 = vpop.eup %2011  ;;  %2021 = vrcp.f32 %v849_v34 }
 0x204   : > { %v942_v7 = vmul.f32 %v2012_v61, %v2789_v44  ;;  %1711 = vmatprep.mubr.bf16.mxu1 %v996_v50 }
 0x205   : > { %v2014_v0 = vpop.eup %2013 }
 0x206   : > { %v2016_v38 = vpop.eup %2015  ;;  %v974_v53 = vmul.f32 %v942_v7, %v2792_v27  ;;  %v943_v9 = vmul.f32 %v2014_v0, %v2794_v36 }
 0x207   : > { %v850_v49 = vadd.f32 1.0, %v2016_v38 }
 0x208   : > { %v2018_v19 = vpop.eup %2017  ;;  %v975_v48 = vmul.f32 %v943_v9, %v2798_v37 }
 0x209   : > { %2023 = vrcp.f32 %v850_v49  ;;  %v851_v18 = vadd.f32 1.0, %v2018_v19 }
 0x20a   : > { %v997_v30 = vpack.c.bf16 %v975_v48, %v974_v53 }
 0x20b   : > { %v2020_v56 = vpop.eup %2019  ;;  %2025 = vrcp.f32 %v851_v18 }
 0x20c   : > { %v944_v60 = vmul.f32 %v2020_v56, %v673_v47  ;;  %1712 = vmatmul.mubr.bf16.gmra.mrb[32].mxu1 %v997_v30 }
 0x20d   : > { %v2022_v28 = vpop.eup %2021 }
 0x20e   : > { %v976_v44 = vmul.f32 %v944_v60, %v675_v41  ;;  %v945_v59 = vmul.f32 %v2022_v28, %v677_v63 }
 0x210   : > { %v977_v35 = vmul.f32 %v945_v59, %v679_v6 }
 0x212   : > { %v998_v42 = vpack.c.bf16 %v977_v35, %v976_v44 }
 0x213   : > { %v2024_v10 = vpop.eup %2023 }
 0x214   : > { %v946_v27 = vmul.f32 %v2024_v10, %v683_v13  ;;  %1715 = vmatprep.mubr.bf16.mxu1 %v998_v42 }
 0x215   : > { %v2026_v36 = vpop.eup %2025 }
 0x216   : > { %v978_v16 = vmul.f32 %v946_v27, %v685_v22  ;;  %v947_v4 = vmul.f32 %v2026_v36, %v687_v21 }
 0x218   : > { %v979_v5 = vmul.f32 %v947_v4, %v689_v8 }
 0x21a   : > { %v999_v37 = vpack.c.bf16 %v979_v5, %v978_v16 }
 0x21c   : > { %1716 = vmatmul.mubr.bf16.gmra.mrb[36].mxu1 %v999_v37 }
 0x21d   : > { %1719 = vmatprep.mubr.bf16.mxu1 %v1000_v23 }
 0x224   : > { %1720 = vmatmul.mubr.bf16.gmra.mrb[40].mxu1 %v1001_v2 }
 0x225   : > { %1723 = vmatprep.mubr.bf16.mxu1 %v1002_v31 }
 0x22c   : > { %1724 = vmatmul.mubr.bf16.gmra.mrb[44].mxu1 %v1003_v3 }
 0x2a0   : > { %v2827_v47 = vpop.f32.mrb[16].mxu1 }
 0x2a1   : > { %v2829_v41 = vpop.f32.mrb[17].mxu1  ;;  %1235 = vst [vmem:[%s2893_s17 + $0x10] sm:$0xff] (!%p1596_p6), %v2827_v47 }
 0x2a2   : > { %v2831_v63 = vpop.f32.mrb[18].mxu1  ;;  %1233 = vst [vmem:[%s2893_s17] sm:$0xff] (!%p1596_p6), %v2829_v41 }
 0x2a3   : > { %v2833_v1 = vpop.f32.mrb[19].mxu1  ;;  %1236 = vst [vmem:[%s2893_s17 + $0x18] sm:$0xff] (!%p1596_p6), %v2831_v63 }
 0x2a4   : > { %1234 = vst [vmem:[%s2893_s17 + $0x8] sm:$0xff] (!%p1596_p6), %v2833_v1 }
 0x2b0   : > { %v2835_v45 = vpop.f32.mrb[20].mxu1 }
 0x2b1   : > { %v2837_v23 = vpop.f32.mrb[21].mxu1  ;;  %1239 = vst [vmem:[%s2893_s17 + $0x30] sm:$0xff] (!%p1596_p6), %v2835_v45 }
 0x2b2   : > { %v2839_v32 = vpop.f32.mrb[22].mxu1  ;;  %1237 = vst [vmem:[%s2893_s17 + $0x20] sm:$0xff] (!%p1596_p6), %v2837_v23 }
 0x2b3   : > { %v2841_v57 = vpop.f32.mrb[23].mxu1  ;;  %1240 = vst [vmem:[%s2893_s17 + $0x38] sm:$0xff] (!%p1596_p6), %v2839_v32 }
 0x2b4   : > { %1238 = vst [vmem:[%s2893_s17 + $0x28] sm:$0xff] (!%p1596_p6), %v2841_v57 }
 0x2c0   : > { %v2843_v2 = vpop.f32.mrb[24].mxu1 }
 0x2c1   : > { %v2845_v12 = vpop.f32.mrb[25].mxu1  ;;  %1243 = vst [vmem:[%s2893_s17 + $0x50] sm:$0xff] (!%p1596_p6), %v2843_v2 }
 0x2c2   : > { %v2847_v26 = vpop.f32.mrb[26].mxu1  ;;  %1241 = vst [vmem:[%s2893_s17 + $0x40] sm:$0xff] (!%p1596_p6), %v2845_v12 }
 0x2c3   : > { %v2849_v31 = vpop.f32.mrb[27].mxu1  ;;  %1244 = vst [vmem:[%s2893_s17 + $0x58] sm:$0xff] (!%p1596_p6), %v2847_v26 }
 0x2c4   : > { %1242 = vst [vmem:[%s2893_s17 + $0x48] sm:$0xff] (!%p1596_p6), %v2849_v31 }
 0x2cf   : > { %v2851_v58 = vpop.f32.mrb[28].mxu1 }
 0x2d0   : > { %v2853_v62 = vpop.f32.mrb[29].mxu1  ;;  %1247 = vst [vmem:[%s2893_s17 + $0x70] sm:$0xff] (!%p1596_p6), %v2851_v58 }
 0x2d1   : > { %v2855_v3 = vpop.f32.mrb[30].mxu1  ;;  %1245 = vst [vmem:[%s2893_s17 + $0x60] sm:$0xff] (!%p1596_p6), %v2853_v62 }
 0x2d2   : > { %v2857_v6 = vpop.f32.mrb[31].mxu1  ;;  %1248 = vst [vmem:[%s2893_s17 + $0x78] sm:$0xff] (!%p1596_p6), %v2855_v3 }
 0x2d3   : > { %1246 = vst [vmem:[%s2893_s17 + $0x68] sm:$0xff] (!%p1596_p6), %v2857_v6 }
 0x2df   : > { %v2859_v25 = vpop.f32.mrb[32].mxu1 }
 0x2e0   : > { %v2861_v43 = vpop.f32.mrb[33].mxu1  ;;  %1251 = vst [vmem:[%s2893_s17 + $0x90] sm:$0xff] (!%p1596_p6), %v2859_v25 }
 0x2e1   : > { %v2863_v54 = vpop.f32.mrb[34].mxu1  ;;  %1249 = vst [vmem:[%s2893_s17 + $0x80] sm:$0xff] (!%p1596_p6), %v2861_v43 }
 0x2e2   : > { %v2865_v46 = vpop.f32.mrb[35].mxu1  ;;  %1252 = vst [vmem:[%s2893_s17 + $0x98] sm:$0xff] (!%p1596_p6), %v2863_v54 }
 0x2e3   : > { %1250 = vst [vmem:[%s2893_s17 + $0x88] sm:$0xff] (!%p1596_p6), %v2865_v46 }
 0x2ef   : > { %v2867_v11 = vpop.f32.mrb[36].mxu1 }
 0x2f0   : > { %v2869_v13 = vpop.f32.mrb[37].mxu1  ;;  %1255 = vst [vmem:[%s2893_s17 + $0xb0] sm:$0xff] (!%p1596_p6), %v2867_v11 }
 0x2f1   : > { %v2871_v15 = vpop.f32.mrb[38].mxu1  ;;  %1253 = vst [vmem:[%s2893_s17 + $0xa0] sm:$0xff] (!%p1596_p6), %v2869_v13 }
 0x2f2   : > { %v2873_v55 = vpop.f32.mrb[39].mxu1  ;;  %1256 = vst [vmem:[%s2893_s17 + $0xb8] sm:$0xff] (!%p1596_p6), %v2871_v15 }
 0x2f3   : > { %1254 = vst [vmem:[%s2893_s17 + $0xa8] sm:$0xff] (!%p1596_p6), %v2873_v55 }
 0x2f7   : > { %v2875_v22 = vpop.f32.mrb[40].mxu1 }
 0x2f8   : > { %v2877_v20 = vpop.f32.mrb[41].mxu1  ;;  %1259 = vst [vmem:[%s2893_s17 + $0xd0] sm:$0xff] (!%p1596_p6), %v2875_v22 }
 0x2f9   : > { %v2879_v21 = vpop.f32.mrb[42].mxu1  ;;  %1257 = vst [vmem:[%s2893_s17 + $0xc0] sm:$0xff] (!%p1596_p6), %v2877_v20 }
 0x2fa   : > { %v2881_v51 = vpop.f32.mrb[43].mxu1  ;;  %1260 = vst [vmem:[%s2893_s17 + $0xd8] sm:$0xff] (!%p1596_p6), %v2879_v21 }
 0x2fb   : > { %1258 = vst [vmem:[%s2893_s17 + $0xc8] sm:$0xff] (!%p1596_p6), %v2881_v51 }
 0x2fc   : > { %1232 = sbr.rel (%p1596_p6) target bundleno = 772 (0x304), region = 48 }
 0x2ff   : > { %v2883_v33 = vpop.f32.mrb[44].mxu1 }
 0x300   : > { %v2885_v8 = vpop.f32.mrb[45].mxu1  ;;  %1263 = vst [vmem:[%s2893_s17 + $0xf0] sm:$0xff] (!%p1596_p6), %v2883_v33 }
 0x301   : > { %v2887_v39 = vpop.f32.mrb[46].mxu1  ;;  %1261 = vst [vmem:[%s2893_s17 + $0xe0] sm:$0xff] (!%p1596_p6), %v2885_v8 }
 0x302   : > { %v2889_v24 = vpop.f32.mrb[47].mxu1  ;;  %1264 = vst [vmem:[%s2893_s17 + $0xf8] sm:$0xff] (!%p1596_p6), %v2887_v39 }
 0x303   : > { %1262 = vst [vmem:[%s2893_s17 + $0xe8] sm:$0xff] %v2889_v24 }
 0x304 PF: > { %p1597_p4 = scmp.le.s32.totalorder %s2227_s18, 0 }
 0x305   : > { %v1269_v29 = vld [vmem:[%s2893_s17] sm:$0xff] (!%p1597_p4)  ;;  %v1270_v40 = vld [vmem:[%s2893_s17 + $0x8] sm:$0xff] (!%p1597_p4)  ;;  %v1271_v14 = vld [vmem:[%s2893_s17 + $0x10] sm:$0xff] (!%p1597_p4) }
 0x306   : > { %1268 = sbr.rel (%p1597_p4) target bundleno = 792 (0x318), region = 52  ;;  %v1301_v52 = vadd.f32 (!%p1597_p4), %v1269_v29, %v2829_v41  ;;  %v1302_v17 = vadd.f32 (!%p1597_p4), %v1270_v40, %v2833_v1  ;;  %v1303_v34 = vadd.f32 (!%p1597_p4), %v2827_v47, %v1271_v14  ;;  %v1272_v50 = vld [vmem:[%s2893_s17 + $0x18] sm:$0xff] (!%p1597_p4)  ;;  %v1273_v61 = vld [vmem:[%s2893_s17 + $0x20] sm:$0xff] (!%p1597_p4)  ;;  %v1274_v7 = vld [vmem:[%s2893_s17 + $0x28] sm:$0xff] (!%p1597_p4) }
 0x307   : > { %v1304_v0 = vadd.f32 (!%p1597_p4), %v2831_v63, %v1272_v50  ;;  %v1305_v38 = vadd.f32 (!%p1597_p4), %v1273_v61, %v2837_v23  ;;  %v1306_v53 = vadd.f32 (!%p1597_p4), %v1274_v7, %v2841_v57  ;;  %v1275_v9 = vld [vmem:[%s2893_s17 + $0x30] sm:$0xff] (!%p1597_p4)  ;;  %v1276_v49 = vld [vmem:[%s2893_s17 + $0x38] sm:$0xff] (!%p1597_p4)  ;;  %v1277_v19 = vld [vmem:[%s2893_s17 + $0x40] sm:$0xff] (!%p1597_p4) }
 0x308   : > { %1333 = vst [vmem:[%s2893_s17] sm:$0xff] (!%p1597_p4), %v1301_v52  ;;  %1334 = vst [vmem:[%s2893_s17 + $0x8] sm:$0xff] (!%p1597_p4), %v1302_v17  ;;  %v1307_v48 = vadd.f32 (!%p1597_p4), %v2835_v45, %v1275_v9  ;;  %v1308_v18 = vadd.f32 (!%p1597_p4), %v2839_v32, %v1276_v49  ;;  %v1309_v30 = vadd.f32 (!%p1597_p4), %v1277_v19, %v2845_v12  ;;  %v1278_v56 = vld [vmem:[%s2893_s17 + $0x48] sm:$0xff] (!%p1597_p4)  ;;  %v1279_v60 = vld [vmem:[%s2893_s17 + $0x50] sm:$0xff] (!%p1597_p4) }
 0x309   : > { %1335 = vst [vmem:[%s2893_s17 + $0x10] sm:$0xff] (!%p1597_p4), %v1303_v34  ;;  %v1280_v28 = vld [vmem:[%s2893_s17 + $0x58] sm:$0xff] (!%p1597_p4)  ;;  %1336 = vst [vmem:[%s2893_s17 + $0x18] sm:$0xff] (!%p1597_p4), %v1304_v0  ;;  %v1310_v44 = vadd.f32 (!%p1597_p4), %v1278_v56, %v2849_v31  ;;  %v1311_v59 = vadd.f32 (!%p1597_p4), %v2843_v2, %v1279_v60  ;;  %v1281_v42 = vld [vmem:[%s2893_s17 + $0x60] sm:$0xff] (!%p1597_p4) }
 0x30a   : > { %1337 = vst [vmem:[%s2893_s17 + $0x20] sm:$0xff] (!%p1597_p4), %v1305_v38  ;;  %1338 = vst [vmem:[%s2893_s17 + $0x28] sm:$0xff] (!%p1597_p4), %v1306_v53  ;;  %v1312_v35 = vadd.f32 (!%p1597_p4), %v2847_v26, %v1280_v28  ;;  %v1282_v10 = vld [vmem:[%s2893_s17 + $0x68] sm:$0xff] (!%p1597_p4)  ;;  %v1283_v27 = vld [vmem:[%s2893_s17 + $0x70] sm:$0xff] (!%p1597_p4)  ;;  %v1313_v36 = vadd.f32 (!%p1597_p4), %v1281_v42, %v2853_v62 }
 0x30b   : > { %1339 = vst [vmem:[%s2893_s17 + $0x30] sm:$0xff] (!%p1597_p4), %v1307_v48  ;;  %1340 = vst [vmem:[%s2893_s17 + $0x38] sm:$0xff] (!%p1597_p4), %v1308_v18  ;;  %v1314_v16 = vadd.f32 (!%p1597_p4), %v1282_v10, %v2857_v6  ;;  %v1315_v4 = vadd.f32 (!%p1597_p4), %v2851_v58, %v1283_v27  ;;  %v1284_v5 = vld [vmem:[%s2893_s17 + $0x78] sm:$0xff] (!%p1597_p4)  ;;  %v1285_v37 = vld [vmem:[%s2893_s17 + $0x80] sm:$0xff] (!%p1597_p4) }
 0x30c   : > { %1341 = vst [vmem:[%s2893_s17 + $0x40] sm:$0xff] (!%p1597_p4), %v1309_v30  ;;  %v1286_v47 = vld [vmem:[%s2893_s17 + $0x88] sm:$0xff] (!%p1597_p4)  ;;  %1342 = vst [vmem:[%s2893_s17 + $0x48] sm:$0xff] (!%p1597_p4), %v1310_v44  ;;  %v1316_v41 = vadd.f32 (!%p1597_p4), %v2855_v3, %v1284_v5  ;;  %v1317_v63 = vadd.f32 (!%p1597_p4), %v1285_v37, %v2861_v43  ;;  %v1287_v45 = vld [vmem:[%s2893_s17 + $0x90] sm:$0xff] (!%p1597_p4) }
 0x30d   : > { %1343 = vst [vmem:[%s2893_s17 + $0x50] sm:$0xff] %v1311_v59  ;;  %1344 = vst [vmem:[%s2893_s17 + $0x58] sm:$0xff] %v1312_v35  ;;  %v1318_v1 = vadd.f32 %v1286_v47, %v2865_v46  ;;  %v1288_v23 = vld [vmem:[%s2893_s17 + $0x98] sm:$0xff]  ;;  %v1289_v32 = vld [vmem:[%s2893_s17 + $0xa0] sm:$0xff]  ;;  %v1319_v57 = vadd.f32 %v2859_v25, %v1287_v45 }
 0x30e   : > { %1345 = vst [vmem:[%s2893_s17 + $0x60] sm:$0xff] %v1313_v36  ;;  %1346 = vst [vmem:[%s2893_s17 + $0x68] sm:$0xff] %v1314_v16  ;;  %v1320_v2 = vadd.f32 %v2863_v54, %v1288_v23  ;;  %v1321_v12 = vadd.f32 %v1289_v32, %v2869_v13  ;;  %v1290_v26 = vld [vmem:[%s2893_s17 + $0xa8] sm:$0xff]  ;;  %v1291_v31 = vld [vmem:[%s2893_s17 + $0xb0] sm:$0xff] }
 0x30f   : > { %1347 = vst [vmem:[%s2893_s17 + $0x70] sm:$0xff] %v1315_v4  ;;  %v1292_v58 = vld [vmem:[%s2893_s17 + $0xb8] sm:$0xff]  ;;  %1348 = vst [vmem:[%s2893_s17 + $0x78] sm:$0xff] %v1316_v41  ;;  %v1322_v62 = vadd.f32 %v1290_v26, %v2873_v55  ;;  %v1323_v3 = vadd.f32 %v2867_v11, %v1291_v31  ;;  %v1293_v25 = vld [vmem:[%s2893_s17 + $0xc0] sm:$0xff] }
 0x310   : > { %1349 = vst [vmem:[%s2893_s17 + $0x80] sm:$0xff] %v1317_v63  ;;  %1350 = vst [vmem:[%s2893_s17 + $0x88] sm:$0xff] %v1318_v1  ;;  %v1324_v6 = vadd.f32 %v2871_v15, %v1292_v58  ;;  %v1294_v43 = vld [vmem:[%s2893_s17 + $0xc8] sm:$0xff]  ;;  %v1295_v54 = vld [vmem:[%s2893_s17 + $0xd0] sm:$0xff]  ;;  %v1325_v46 = vadd.f32 %v1293_v25, %v2877_v20 }
 0x311   : > { %1351 = vst [vmem:[%s2893_s17 + $0x90] sm:$0xff] %v1319_v57  ;;  %1352 = vst [vmem:[%s2893_s17 + $0x98] sm:$0xff] %v1320_v2  ;;  %v1326_v13 = vadd.f32 %v1294_v43, %v2881_v51  ;;  %v1327_v11 = vadd.f32 %v2875_v22, %v1295_v54  ;;  %v1296_v55 = vld [vmem:[%s2893_s17 + $0xd8] sm:$0xff]  ;;  %v1297_v15 = vld [vmem:[%s2893_s17 + $0xe0] sm:$0xff] }
 0x312   : > { %1353 = vst [vmem:[%s2893_s17 + $0xa0] sm:$0xff] %v1321_v12  ;;  %v1298_v29 = vld [vmem:[%s2893_s17 + $0xe8] sm:$0xff]  ;;  %1354 = vst [vmem:[%s2893_s17 + $0xa8] sm:$0xff] %v1322_v62  ;;  %v1328_v40 = vadd.f32 %v2879_v21, %v1296_v55  ;;  %v1329_v20 = vadd.f32 %v1297_v15, %v2885_v8  ;;  %v1299_v51 = vld [vmem:[%s2893_s17 + $0xf0] sm:$0xff] }
 0x313   : > { %1355 = vst [vmem:[%s2893_s17 + $0xb0] sm:$0xff] %v1323_v3  ;;  %1356 = vst [vmem:[%s2893_s17 + $0xb8] sm:$0xff] %v1324_v6  ;;  %v1330_v14 = vadd.f32 %v1298_v29, %v2889_v24  ;;  %v1300_v52 = vld [vmem:[%s2893_s17 + $0xf8] sm:$0xff]  ;;  %v1331_v22 = vadd.f32 %v2883_v33, %v1299_v51 }
 0x314   : > { %1357 = vst [vmem:[%s2893_s17 + $0xc0] sm:$0xff] %v1325_v46  ;;  %1358 = vst [vmem:[%s2893_s17 + $0xc8] sm:$0xff] %v1326_v13  ;;  %v1332_v17 = vadd.f32 %v2887_v39, %v1300_v52 }
 0x315   : > { %1359 = vst [vmem:[%s2893_s17 + $0xd0] sm:$0xff] %v1327_v11  ;;  %1360 = vst [vmem:[%s2893_s17 + $0xd8] sm:$0xff] %v1328_v40 }
 0x316   : > { %1361 = vst [vmem:[%s2893_s17 + $0xe0] sm:$0xff] %v1329_v20  ;;  %1362 = vst [vmem:[%s2893_s17 + $0xe8] sm:$0xff] %v1330_v14 }
 0x317   : > { %1363 = vst [vmem:[%s2893_s17 + $0xf0] sm:$0xff] %v1331_v22  ;;  %1364 = vst [vmem:[%s2893_s17 + $0xf8] sm:$0xff] %v1332_v17 }
 0x318 PF: > { %s1606_s18 = sshll.u32 %s2231_s19, 12  ;;  %s3182_s4 = sld [smem:[#allocation22_spill]] }
 0x319   : > { %s1379_s8 = sshll.u32 %s2893_s17, 4  ;;  %s1366_s3 = scalar_lea.sflag [#allocation4], %s2540_s24  ;;  %s3064_s8 = int_to_ptr.vmem [resolvable:$true] %s1379_s8 }
 0x31a   : > { %s2117_s5 = scalar_lea.vmem %s3064_s8, 4096  ;;  %p3183_p3 = scmp.ne.s32.totalorder %s3170_s25, 0 }
 0x31b   : > { %p2118_p1 = scmp.ne.s32.totalorder %s3064_s8, %s2117_s5  ;;  %s2250_s7 = smov [#allocation8]  }
 0x31c   : > { %s2121_s21 = sshll.u32 %s2250_s7, 4  ;;  %s2122_s21 = int_to_ptr.vmem [resolvable:$false] %s2121_s21 }
 0x31d   : > { %p2119_p2 = pnand %p2118_p1, %p3183_p3  ;;  %s2123_s19 = scalar_lea.vmem %s2122_s21, 8192 }
 0x31e   : > { %s3061_s9 = scalar_lea.hbm %s3182_s4, %s1606_s18  ;;  %p2124_p0 = scmp.lt.s32.totalorder %s3064_s8, %s2122_s21 }
 0x31f   : > { %p2120_p12 = pneg %p2119_p2  ;;  %p2125_p7 = scmp.lt.s32.totalorder %s2123_s19, %s2117_s5 }
 0x321   : > { %p2126_p8 = por %p2125_p7, %p2124_p0 }
 0x323   : > { %p2127_p11 = pnand %p2126_p8, %p2120_p12 }
 0x325   : > { %2130 = shalt.err (!%p2127_p11)
}
 0x326   : > { %s2131_s1 = scalar_lea.hbm %s3061_s9, 4096  ;;  %s2135_s12 = scalar_lea.hbm %s3182_s4, 8192 }
 0x327   : > { %p2132_p5 = scmp.ne.s32.totalorder %s3061_s9, %s2131_s1  ;;  %p2136_p9 = scmp.lt.u32.totalorder %s3061_s9, %s3182_s4 }
 0x328   : > { %p2137_p6 = scmp.lt.u32.totalorder %s2135_s12, %s2131_s1  ;;  %p2139_p1 = scmp.lt.u32.totalorder %s2131_s1, %s3061_s9 }
 0x329   : > { %p2133_p13 = pnand %p2132_p5, %p3183_p3 }
 0x32a   : > { %p2138_p4 = por %p2137_p6, %p2136_p9 }
 0x32b   : > { %p2134_p10 = pneg %p2133_p13 }
 0x32c   : > { %p2140_p2 = por %p2139_p1, %p2138_p4 }
 0x32e   : > { %p2141_p12 = pnand %p2140_p2, %p2134_p10 }
 0x330   : > { %2144 = shalt.err (!%p2141_p12)
}
 0x331   : > { %s2251_s30 = smov 128   ;;  %s2252_s29 = smov 8  }
 0x332   : > { %1749 = dma.vmem_to_hbm [thread:$0]  (%p3183_p3), %s3064_s8, 4096, %s3061_s9, %s1366_s3, %s2251_s30, %s2251_s30, %s2252_s29  }
 0x333 PF: > { %s3184_s11 = sld [smem:[#allocation13_spill]]  ;;  %p1766_p0 = scmp.ge.s32.totalorder %s2243_s22, 2 }
 0x334   : > { %p3185_p7 = scmp.ne.s32.totalorder %s3171_s6, 0 }
 0x336   : > { %p1762_p8 = pnand %p1766_p0, %p3185_p7 }
 0x339   : > { %s1394_s23 = sand.u32 1, %s3184_s11  }
 0x33a   : > { %s1395_s28 = scalar_lea.sflag [#allocation4], %s1394_s23 }
 0x33b   : > { %2198 = dma.done.wait (!%p1762_p8), %s1395_s28, 4096  }
 0x33c   : > { %2200 = vsyncadd (!%p1762_p8), %s1395_s28, 4294963200  ;;  %s22_s22 = sadd.s32 1, %s2243_s22   ;;  %s3186_s17 = sld [smem:[#allocation12_spill]] }
 0x33d   : > { %p19_p11 = scmp.ge.s32.totalorder %s22_s22, 8   ;;  %s3187_s14 = sld [smem:[#allocation18_spill]] }
 0x33e   : > { %s3188_s25 = sld [smem:[#allocation14_spill]]  ;;  %s3189_s24 = sld [smem:[#allocation20_spill]] }
 0x33f   : > { %s3190_s18 = sld [smem:[#allocation15_spill]]  ;;  %s3191_s19 = sld [smem:[#allocation16_spill]] }
 0x340   : > { %s3192_s20 = sld [smem:[#allocation17_spill]]  ;;  %s3193_s21 = sld [smem:[#allocation19_spill]] }
 0x341   : > { %s3194_s12 = smov %s2207_s13  ;;  %s3196_s15 = smov %s2219_s16 }
 0x342   : > { %s3195_s13 = smov %s3186_s17  ;;  %21 = sbr.rel (!%p19_p11) target bundleno = 14 (0xe), region = 109 }
 0x344   : > { %s3197_s16 = smov %s3188_s25  ;;  %s3198_s17 = smov %s3189_s24 }
 0x349   :  { %1400 = vsyncpa [#allocation3], 1 }
 0x34a   :  { %1402 = vsyncpa [#allocation3 + $0x1], 1 }
 0x34b   :  { %1403 = vsyncpa [#allocation6], 1 }
 0x34c   :  { %1405 = vsyncpa [#allocation6 + $0x1], 1 }
 0x34d   :  { %1406 = vsyncpa [#allocation4], 1 }
 0x34e   :  { %1408 = vsyncpa [#allocation4 + $0x1], 1 }

</bundles_post_ra>
